<compile_context>
chip_gen: v5e
topology: v5e:2x2
jax: 0.10.0
libtpu: 0.0.40
codegen_flags: <defaults>
</compile_context>

<pallas_src>
import functools

import jax
import jax.numpy as jnp
from jax.experimental import pallas as pl
from jax.experimental.pallas import tpu as pltpu

EPS = 1e-5


def _decoder_kernel(H, W, C4, C8, LPAD, cdtype,
                    x_ref, w1_ref, b1_ref, kw_ref, kh_ref,
                    b2a_ref, b2b_ref, w3a_ref, w3b_ref, b3_ref,
                    o_ref, pad_ref):
    """One image per grid step, channels-major (C, H*W) layout, H*W on lanes."""
    S = H * W

    # Zero the halos of the padded scratch every step (cheap: 2*(C4,LPAD) bf16
    # stores).  Needed only by the H-direction taps; kept per-step so each grid
    # iteration is self-contained under megacore sharding.
    zero_halo = jnp.zeros((C4, LPAD), cdtype)
    pad_ref[:, :LPAD] = zero_halo
    pad_ref[:, LPAD + S:] = zero_halo

    # W-direction boundary masks, built ONCE per grid step.  Masking columns of
    # the RHS commutes with the matmul, so each mask multiplies the (C8,S) dot
    # result (smaller than the (C4,S) operand) and each mask is used exactly once.
    col = jax.lax.broadcasted_iota(jnp.int32, (1, S), 1) % W
    wmaskf = {d: jnp.logical_and(col + d >= 0, col + d < W).astype(jnp.float32)
              for d in range(-4, 5) if d != 0}

    # conv1 (1x1) + folded bn1 + relu  -> (C4, S), S on lanes.
    x = x_ref[0].astype(cdtype)                                    # (C, S)
    h = jnp.dot(w1_ref[...], x, preferred_element_type=jnp.float32) + b1_ref[...]
    h = jnp.maximum(h, 0.0).astype(cdtype)                         # (C4, S)

    # Single compute-dtype store of the activation into the padded scratch.
    pad_ref[:, LPAD:LPAD + S] = h

    # Both ConvTranspose2d's as 9+9 MXU-accumulated taps on pad_ref slices.
    acc1 = jnp.zeros((C8, S), jnp.float32)     # deconv1 (1x9), W-direction
    acc2 = jnp.zeros((C8, S), jnp.float32)     # deconv2 (9x1), H-direction
    for j in range(9):
        d = j - 4
        # --- deconv1 tap: shift by d columns; boundary handled post-dot mask ---
        xs = h if d == 0 else pad_ref[:, LPAD + d:LPAD + d + S]
        pw = jnp.dot(kw_ref[j], xs, preferred_element_type=jnp.float32)
        acc1 = acc1 + (pw if d == 0 else pw * wmaskf[d])
        # --- deconv2 tap: shift by d rows (d*W flat); zero halo handles bounds ---
        xh = h if d == 0 else pad_ref[:, LPAD + d * W:LPAD + d * W + S]
        acc2 = acc2 + jnp.dot(kh_ref[j], xh, preferred_element_type=jnp.float32)

    # folded bn2 + relu (applied pre-upsample; nearest 2x commutes).
    y1 = jnp.maximum(acc1 + b2a_ref[...], 0.0).astype(cdtype)      # (C8, S)
    y2 = jnp.maximum(acc2 + b2b_ref[...], 0.0).astype(cdtype)      # (C8, S)

    # conv3 (1x1) + folded bn3 + relu, with w3 split per concat half so
    # cat(x1, x2) is never materialized.  Lane-dense (NF, S) store.
    out = (jnp.dot(w3a_ref[...], y1, preferred_element_type=jnp.float32)
           + jnp.dot(w3b_ref[...], y2, preferred_element_type=jnp.float32)
           + b3_ref[...])
    o_ref[0] = jnp.maximum(out, 0.0).astype(o_ref.dtype)


def _fold_bn(gamma, beta, mean, var):
    s = gamma / jnp.sqrt(var + EPS)
    return s, beta - mean * s


@functools.partial(jax.jit, static_argnames=("compute_dtype", "out_dtype"))
def decoder_block_1dconv2(x_nchw, p, *, compute_dtype=jnp.bfloat16,
                          out_dtype=jnp.float32):
    N, C, H, W = x_nchw.shape
    assert C % 8 == 0, "in_channels must be divisible by 8 (module uses C/4, C/8)"
    C4, C8 = C // 4, C // 8
    NF = p["conv3_w"].shape[0]
    S = H * W
    LPAD = ((max(4 * W, 4) + 127) // 128) * 128    # lane-aligned halo >= 4 rows/cols

    s1, t1 = _fold_bn(*p["bn1"])
    s2, t2 = _fold_bn(*p["bn2"])
    s3, t3 = _fold_bn(*p["bn3"])

    # conv1 (1x1) + bn1 folded: h = W1 @ x + b1   (channels-major)
    w1_eff = (p["conv1_w"][:, :, 0, 0] * s1[:, None]).astype(compute_dtype)   # (C4, C)
    b1_eff = (p["conv1_b"] * s1 + t1)[:, None]                                # (C4, 1)

    # Deconv taps (ConvTranspose2d stride 1 == "same" correlation with io-swapped,
    # spatially flipped kernel), bn2 scale folded per concat half, laid out as
    # (9, C8, C4): one (C8, C4) weight per shift d = j - 4.
    s2a, t2a = s2[:C8], t2[:C8]
    s2b, t2b = s2[C8:], t2[C8:]
    kw = jnp.transpose(p["d1_w"][:, :, 0, ::-1], (1, 2, 0)) * s2a[:, None, None]  # (C8,9,C4)
    kh = jnp.transpose(p["d2_w"][:, :, ::-1, 0], (1, 2, 0)) * s2b[:, None, None]  # (C8,9,C4)
    kw_eff = jnp.transpose(kw, (1, 0, 2)).astype(compute_dtype)                   # (9,C8,C4)
    kh_eff = jnp.transpose(kh, (1, 0, 2)).astype(compute_dtype)                   # (9,C8,C4)
    b2a_eff = (p["d1_b"] * s2a + t2a)[:, None]                                    # (C8, 1)
    b2b_eff = (p["d2_b"] * s2b + t2b)[:, None]                                    # (C8, 1)

    # conv3 (1x1) + bn3 folded, split per concat half (avoids materializing cat).
    w3 = p["conv3_w"][:, :, 0, 0] * s3[:, None]                                   # (NF, C4)
    w3a_eff = w3[:, :C8].astype(compute_dtype)                                    # (NF, C8)
    w3b_eff = w3[:, C8:].astype(compute_dtype)                                    # (NF, C8)
    b3_eff = (p["conv3_b"] * s3 + t3)[:, None]                                    # (NF, 1)

    # NCHW -> (N, C, H*W): free reshape (channels already major).
    x2d = x_nchw.reshape(N, C, S)

    # Scoped-VMEM budget: double-buffered in/out blocks + weights + pad scratch,
    # with headroom; floor at the 32 MiB default, cap at v7x-safe 64 MiB.
    csz = jnp.dtype(compute_dtype).itemsize
    pad_bytes = C4 * (S + 2 * LPAD) * csz
    io_bytes = 2 * (C * S * x2d.dtype.itemsize + NF * S * jnp.dtype(out_dtype).itemsize)
    w_bytes = 2 * ((C4 * C + 18 * C8 * C4 + 2 * NF * C8) * csz
                   + (C4 + 2 * C8 + NF) * 4)
    vmem_limit = int(min(max(2 * (pad_bytes + io_bytes + w_bytes), 32 << 20), 64 << 20))

    kernel = functools.partial(_decoder_kernel, H, W, C4, C8, LPAD, compute_dtype)
    grid_spec = pltpu.PrefetchScalarGridSpec(
        num_scalar_prefetch=0,
        grid=(N,),
        in_specs=[
            pl.BlockSpec((1, C, S), lambda n: (n, 0, 0)),
            pl.BlockSpec((C4, C), lambda n: (0, 0)),
            pl.BlockSpec((C4, 1), lambda n: (0, 0)),
            pl.BlockSpec((9, C8, C4), lambda n: (0, 0, 0)),
            pl.BlockSpec((9, C8, C4), lambda n: (0, 0, 0)),
            pl.BlockSpec((C8, 1), lambda n: (0, 0)),
            pl.BlockSpec((C8, 1), lambda n: (0, 0)),
            pl.BlockSpec((NF, C8), lambda n: (0, 0)),
            pl.BlockSpec((NF, C8), lambda n: (0, 0)),
            pl.BlockSpec((NF, 1), lambda n: (0, 0)),
        ],
        out_specs=pl.BlockSpec((1, NF, S), lambda n: (n, 0, 0)),
        scratch_shapes=[
            pltpu.VMEM((C4, LPAD + S + LPAD), compute_dtype),   # zero-padded activation
        ],
    )
    out2d = pl.pallas_call(
        kernel,
        out_shape=jax.ShapeDtypeStruct((N, NF, S), out_dtype),
        grid_spec=grid_spec,
        compiler_params=pltpu.CompilerParams(
            dimension_semantics=("parallel",),
            vmem_limit_bytes=vmem_limit,
        ),
    )(x2d, w1_eff, b1_eff, kw_eff, kh_eff, b2a_eff, b2b_eff, w3a_eff, w3b_eff, b3_eff)

    # Nearest 2x upsample (pure replication; commutes with the per-pixel ops
    # already applied in the kernel).  Output is already channel-major -> NCHW
    # needs no transpose; this is one fused broadcast+reshape pass.
    y = out2d.reshape(N, NF, H, 1, W, 1)
    y = jnp.broadcast_to(y, (N, NF, H, 2, W, 2)).reshape(N, NF, 2 * H, 2 * W)
    return y


# ---------------------------------------------------------------------------
# Pure-JAX reference (mirrors the PyTorch op sequence literally, eval-mode BN)
# ---------------------------------------------------------------------------
def reference_forward(x, p):
    def bn(y, g, b, m, v):
        s = (g / jnp.sqrt(v + EPS))[None, :, None, None]
        return (y - m[None, :, None, None]) * s + b[None, :, None, None]

    def conv(y, w, b, pad):
        out = jax.lax.conv_general_dilated(
            y, w, (1, 1), pad, dimension_numbers=("NCHW", "OIHW", "NCHW"))
        return out + b[None, :, None, None]

    y = conv(x, p["conv1_w"], p["conv1_b"], "VALID")
    y = jax.nn.relu(bn(y, *p["bn1"]))
    # ConvTranspose2d (stride 1, pad p) == correlation with io-swapped,
    # spatially flipped kernel and padding k - 1 - p
    wt1 = jnp.transpose(p["d1_w"], (1, 0, 2, 3))[:, :, ::-1, ::-1]
    wt2 = jnp.transpose(p["d2_w"], (1, 0, 2, 3))[:, :, ::-1, ::-1]
    x1 = conv(y, wt1, p["d1_b"], ((0, 0), (4, 4)))
    x2 = conv(y, wt2, p["d2_b"], ((4, 4), (0, 0)))
    y = jnp.concatenate([x1, x2], axis=1)
    y = jnp.repeat(jnp.repeat(y, 2, axis=2), 2, axis=3)            # nearest x2
    y = jax.nn.relu(bn(y, *p["bn2"]))
    y = conv(y, p["conv3_w"], p["conv3_b"], "VALID")
    y = jax.nn.relu(bn(y, *p["bn3"]))
    return y


def make_params(key, C, NF):
    C4, C8 = C // 4, C // 8
    ks = jax.random.split(key, 12)

    def nrm(k, shape, scale=0.1):
        return scale * jax.random.normal(k, shape, jnp.float32)

    def bn_params(k, ch):
        k1, k2, k3, k4 = jax.random.split(k, 4)
        gamma = 1.0 + 0.1 * jax.random.normal(k1, (ch,), jnp.float32)
        beta = 0.1 * jax.random.normal(k2, (ch,), jnp.float32)
        mean = 0.1 * jax.random.normal(k3, (ch,), jnp.float32)
        var = 1.0 + 0.1 * jax.random.uniform(k4, (ch,), jnp.float32)
        return gamma, beta, mean, var

    return {
        "conv1_w": nrm(ks[0], (C4, C, 1, 1)),
        "conv1_b": nrm(ks[1], (C4,)),
        "bn1": bn_params(ks[2], C4),
        "d1_w": nrm(ks[3], (C4, C8, 1, 9)),    # ConvTranspose2d weight: (in, out, kH, kW)
        "d1_b": nrm(ks[4], (C8,)),
        "d2_w": nrm(ks[5], (C4, C8, 9, 1)),
        "d2_b": nrm(ks[6], (C8,)),
        "bn2": bn_params(ks[7], C4),
        "conv3_w": nrm(ks[8], (NF, C4, 1, 1)),
        "conv3_b": nrm(ks[9], (NF,)),
        "bn3": bn_params(ks[10], NF),
    }


if __name__ == "__main__":
    N, C, H, W = 2, 32, 16, 16     # in_channels=32 -> C4=8, C8=4
    NF = 16                        # n_filters
    key = jax.random.PRNGKey(0)
    kx, kp = jax.random.split(key)
    x = jax.random.normal(kx, (N, C, H, W), jnp.float32)
    params = make_params(kp, C, NF)

    ref = reference_forward(x, params)

    # Strict check with f32 MXU operands (bit-compatible math up to reassociation).
    out_f32 = jax.block_until_ready(
        decoder_block_1dconv2(x, params, compute_dtype=jnp.float32))
    assert out_f32.shape == (N, NF, 2 * H, 2 * W), out_f32.shape
    err_f32 = float(jnp.max(jnp.abs(out_f32 - ref)))

    # bf16-MXU path (f32 accumulation) with a tolerance matching bf16 rounding.
    out_bf16 = jax.block_until_ready(
        decoder_block_1dconv2(x, params, compute_dtype=jnp.bfloat16))
    err_bf16 = float(jnp.max(jnp.abs(out_bf16 - ref)))

    if err_f32 < 1e-3 and err_bf16 < 2e-2:
        print("KERNEL_OK")
    else:
        print("MISMATCH f32_err=", err_f32, " bf16_err=", err_bf16)
</pallas_src>

<mosaic_0001>
module attributes {stable_mosaic.version = 11 : i64} {
  func.func @_decoder_kernel(%arg0: i32, %arg1: memref<1x32x256xf32, #tpu.memory_space<vmem>>, %arg2: memref<8x32xf32, #tpu.memory_space<vmem>>, %arg3: memref<8x1xf32, #tpu.memory_space<vmem>>, %arg4: memref<9x4x8xf32, #tpu.memory_space<vmem>>, %arg5: memref<9x4x8xf32, #tpu.memory_space<vmem>>, %arg6: memref<4x1xf32, #tpu.memory_space<vmem>>, %arg7: memref<4x1xf32, #tpu.memory_space<vmem>>, %arg8: memref<16x4xf32, #tpu.memory_space<vmem>>, %arg9: memref<16x4xf32, #tpu.memory_space<vmem>>, %arg10: memref<16x1xf32, #tpu.memory_space<vmem>>, %arg11: memref<1x16x256xf32, #tpu.memory_space<vmem>>, %arg12: memref<8x512xf32, #tpu.memory_space<vmem>>) attributes {dimension_semantics = [#tpu.dimension_semantics<parallel>], iteration_bounds = array<i64: 2>, scalar_prefetch = 0 : i64, scratch_operands = 1 : i64, tpu.core_type = #tpu.core_type<tc>, window_params = [{transform_indices = @transform_0, window_bounds = array<i64: 1, 32, 256>}, {pipeline_mode = #tpu.pipeline_mode<synchronous>, transform_indices = @transform_1, window_bounds = array<i64: 8, 32>}, {pipeline_mode = #tpu.pipeline_mode<synchronous>, transform_indices = @transform_2, window_bounds = array<i64: 8, 1>}, {pipeline_mode = #tpu.pipeline_mode<synchronous>, transform_indices = @transform_3, window_bounds = array<i64: 9, 4, 8>}, {pipeline_mode = #tpu.pipeline_mode<synchronous>, transform_indices = @transform_4, window_bounds = array<i64: 9, 4, 8>}, {pipeline_mode = #tpu.pipeline_mode<synchronous>, transform_indices = @transform_5, window_bounds = array<i64: 4, 1>}, {pipeline_mode = #tpu.pipeline_mode<synchronous>, transform_indices = @transform_6, window_bounds = array<i64: 4, 1>}, {pipeline_mode = #tpu.pipeline_mode<synchronous>, transform_indices = @transform_7, window_bounds = array<i64: 16, 4>}, {pipeline_mode = #tpu.pipeline_mode<synchronous>, transform_indices = @transform_8, window_bounds = array<i64: 16, 4>}, {pipeline_mode = #tpu.pipeline_mode<synchronous>, transform_indices = @transform_9, window_bounds = array<i64: 16, 1>}, {transform_indices = @transform_10, window_bounds = array<i64: 1, 16, 256>}]} {
    %cst = arith.constant 0.000000e+00 : f32
    %0 = vector.broadcast %cst : f32 to vector<8x128xf32>
    %c0 = arith.constant 0 : index
    %c0_0 = arith.constant 0 : index
    %1 = vector.load %arg12[%c0, %c0_0] : memref<8x512xf32, #tpu.memory_space<vmem>>, vector<8x128xf32>
    tpu.vector_store %arg12[%c0, %c0_0], %0 {strides = array<i32>} : memref<8x512xf32, #tpu.memory_space<vmem>>, vector<8x128xf32>,
    %c0_1 = arith.constant 0 : index
    %c384 = arith.constant 384 : index
    %2 = vector.load %arg12[%c0_1, %c384] : memref<8x512xf32, #tpu.memory_space<vmem>>, vector<8x128xf32>
    tpu.vector_store %arg12[%c0_1, %c384], %0 {strides = array<i32>} : memref<8x512xf32, #tpu.memory_space<vmem>>, vector<8x128xf32>,
    %3 = tpu.iota {dimensions = array<i32: 1>} : vector<1x256xi32>
    %c16_i32 = arith.constant 16 : i32
    %c0_i32 = arith.constant 0 : i32
    %4 = arith.cmpi eq, %c16_i32, %c0_i32 : i32
    %c1_i32 = arith.constant 1 : i32
    %5 = arith.select %4, %c1_i32, %c16_i32 : i32
    %6 = vector.broadcast %5 : i32 to vector<1x256xi32>
    %7 = arith.remsi %3, %6 : vector<1x256xi32>
    %c0_i32_2 = arith.constant 0 : i32
    %8 = vector.broadcast %c0_i32_2 : i32 to vector<1x256xi32>
    %9 = arith.cmpi ne, %7, %8 : vector<1x256xi32>
    %c0_i32_3 = arith.constant 0 : i32
    %10 = vector.broadcast %c0_i32_3 : i32 to vector<1x256xi32>
    %11 = arith.cmpi slt, %7, %10 : vector<1x256xi32>
    %c0_i32_4 = arith.constant 0 : i32
    %12 = arith.cmpi slt, %5, %c0_i32_4 : i32
    %13 = vector.broadcast %12 : i1 to vector<1x256xi1>
    %14 = vector.broadcast %13 : vector<1x256xi1> to vector<1x256xi1>
    %15 = arith.xori %11, %14 : vector<1x256xi1>
    %16 = arith.andi %15, %9 : vector<1x256xi1>
    %17 = vector.broadcast %5 : i32 to vector<1x256xi32>
    %18 = arith.addi %7, %17 : vector<1x256xi32>
    %19 = arith.select %16, %18, %7 : vector<1x256xi1>, vector<1x256xi32>
    %c-4_i32 = arith.constant -4 : i32
    %20 = vector.broadcast %c-4_i32 : i32 to vector<1x256xi32>
    %21 = arith.addi %19, %20 : vector<1x256xi32>
    %c0_i32_5 = arith.constant 0 : i32
    %22 = vector.broadcast %c0_i32_5 : i32 to vector<1x256xi32>
    %23 = arith.cmpi sge, %21, %22 : vector<1x256xi32>
    %c-4_i32_6 = arith.constant -4 : i32
    %24 = vector.broadcast %c-4_i32_6 : i32 to vector<1x256xi32>
    %25 = arith.addi %19, %24 : vector<1x256xi32>
    %c16_i32_7 = arith.constant 16 : i32
    %26 = vector.broadcast %c16_i32_7 : i32 to vector<1x256xi32>
    %27 = arith.cmpi slt, %25, %26 : vector<1x256xi32>
    %28 = arith.andi %23, %27 : vector<1x256xi1>
    %29 = arith.extui %28 : vector<1x256xi1> to vector<1x256xi32>
    %30 = arith.sitofp %29 : vector<1x256xi32> to vector<1x256xf32>
    %c-3_i32 = arith.constant -3 : i32
    %31 = vector.broadcast %c-3_i32 : i32 to vector<1x256xi32>
    %32 = arith.addi %19, %31 : vector<1x256xi32>
    %c0_i32_8 = arith.constant 0 : i32
    %33 = vector.broadcast %c0_i32_8 : i32 to vector<1x256xi32>
    %34 = arith.cmpi sge, %32, %33 : vector<1x256xi32>
    %c-3_i32_9 = arith.constant -3 : i32
    %35 = vector.broadcast %c-3_i32_9 : i32 to vector<1x256xi32>
    %36 = arith.addi %19, %35 : vector<1x256xi32>
    %c16_i32_10 = arith.constant 16 : i32
    %37 = vector.broadcast %c16_i32_10 : i32 to vector<1x256xi32>
    %38 = arith.cmpi slt, %36, %37 : vector<1x256xi32>
    %39 = arith.andi %34, %38 : vector<1x256xi1>
    %40 = arith.extui %39 : vector<1x256xi1> to vector<1x256xi32>
    %41 = arith.sitofp %40 : vector<1x256xi32> to vector<1x256xf32>
    %c-2_i32 = arith.constant -2 : i32
    %42 = vector.broadcast %c-2_i32 : i32 to vector<1x256xi32>
    %43 = arith.addi %19, %42 : vector<1x256xi32>
    %c0_i32_11 = arith.constant 0 : i32
    %44 = vector.broadcast %c0_i32_11 : i32 to vector<1x256xi32>
    %45 = arith.cmpi sge, %43, %44 : vector<1x256xi32>
    %c-2_i32_12 = arith.constant -2 : i32
    %46 = vector.broadcast %c-2_i32_12 : i32 to vector<1x256xi32>
    %47 = arith.addi %19, %46 : vector<1x256xi32>
    %c16_i32_13 = arith.constant 16 : i32
    %48 = vector.broadcast %c16_i32_13 : i32 to vector<1x256xi32>
    %49 = arith.cmpi slt, %47, %48 : vector<1x256xi32>
    %50 = arith.andi %45, %49 : vector<1x256xi1>
    %51 = arith.extui %50 : vector<1x256xi1> to vector<1x256xi32>
    %52 = arith.sitofp %51 : vector<1x256xi32> to vector<1x256xf32>
    %c-1_i32 = arith.constant -1 : i32
    %53 = vector.broadcast %c-1_i32 : i32 to vector<1x256xi32>
    %54 = arith.addi %19, %53 : vector<1x256xi32>
    %c0_i32_14 = arith.constant 0 : i32
    %55 = vector.broadcast %c0_i32_14 : i32 to vector<1x256xi32>
    %56 = arith.cmpi sge, %54, %55 : vector<1x256xi32>
    %c-1_i32_15 = arith.constant -1 : i32
    %57 = vector.broadcast %c-1_i32_15 : i32 to vector<1x256xi32>
    %58 = arith.addi %19, %57 : vector<1x256xi32>
    %c16_i32_16 = arith.constant 16 : i32
    %59 = vector.broadcast %c16_i32_16 : i32 to vector<1x256xi32>
    %60 = arith.cmpi slt, %58, %59 : vector<1x256xi32>
    %61 = arith.andi %56, %60 : vector<1x256xi1>
    %62 = arith.extui %61 : vector<1x256xi1> to vector<1x256xi32>
    %63 = arith.sitofp %62 : vector<1x256xi32> to vector<1x256xf32>
    %c1_i32_17 = arith.constant 1 : i32
    %64 = vector.broadcast %c1_i32_17 : i32 to vector<1x256xi32>
    %65 = arith.addi %19, %64 : vector<1x256xi32>
    %c0_i32_18 = arith.constant 0 : i32
    %66 = vector.broadcast %c0_i32_18 : i32 to vector<1x256xi32>
    %67 = arith.cmpi sge, %65, %66 : vector<1x256xi32>
    %c1_i32_19 = arith.constant 1 : i32
    %68 = vector.broadcast %c1_i32_19 : i32 to vector<1x256xi32>
    %69 = arith.addi %19, %68 : vector<1x256xi32>
    %c16_i32_20 = arith.constant 16 : i32
    %70 = vector.broadcast %c16_i32_20 : i32 to vector<1x256xi32>
    %71 = arith.cmpi slt, %69, %70 : vector<1x256xi32>
    %72 = arith.andi %67, %71 : vector<1x256xi1>
    %73 = arith.extui %72 : vector<1x256xi1> to vector<1x256xi32>
    %74 = arith.sitofp %73 : vector<1x256xi32> to vector<1x256xf32>
    %c2_i32 = arith.constant 2 : i32
    %75 = vector.broadcast %c2_i32 : i32 to vector<1x256xi32>
    %76 = arith.addi %19, %75 : vector<1x256xi32>
    %c0_i32_21 = arith.constant 0 : i32
    %77 = vector.broadcast %c0_i32_21 : i32 to vector<1x256xi32>
    %78 = arith.cmpi sge, %76, %77 : vector<1x256xi32>
    %c2_i32_22 = arith.constant 2 : i32
    %79 = vector.broadcast %c2_i32_22 : i32 to vector<1x256xi32>
    %80 = arith.addi %19, %79 : vector<1x256xi32>
    %c16_i32_23 = arith.constant 16 : i32
    %81 = vector.broadcast %c16_i32_23 : i32 to vector<1x256xi32>
    %82 = arith.cmpi slt, %80, %81 : vector<1x256xi32>
    %83 = arith.andi %78, %82 : vector<1x256xi1>
    %84 = arith.extui %83 : vector<1x256xi1> to vector<1x256xi32>
    %85 = arith.sitofp %84 : vector<1x256xi32> to vector<1x256xf32>
    %c3_i32 = arith.constant 3 : i32
    %86 = vector.broadcast %c3_i32 : i32 to vector<1x256xi32>
    %87 = arith.addi %19, %86 : vector<1x256xi32>
    %c0_i32_24 = arith.constant 0 : i32
    %88 = vector.broadcast %c0_i32_24 : i32 to vector<1x256xi32>
    %89 = arith.cmpi sge, %87, %88 : vector<1x256xi32>
    %c3_i32_25 = arith.constant 3 : i32
    %90 = vector.broadcast %c3_i32_25 : i32 to vector<1x256xi32>
    %91 = arith.addi %19, %90 : vector<1x256xi32>
    %c16_i32_26 = arith.constant 16 : i32
    %92 = vector.broadcast %c16_i32_26 : i32 to vector<1x256xi32>
    %93 = arith.cmpi slt, %91, %92 : vector<1x256xi32>
    %94 = arith.andi %89, %93 : vector<1x256xi1>
    %95 = arith.extui %94 : vector<1x256xi1> to vector<1x256xi32>
    %96 = arith.sitofp %95 : vector<1x256xi32> to vector<1x256xf32>
    %c4_i32 = arith.constant 4 : i32
    %97 = vector.broadcast %c4_i32 : i32 to vector<1x256xi32>
    %98 = arith.addi %19, %97 : vector<1x256xi32>
    %c0_i32_27 = arith.constant 0 : i32
    %99 = vector.broadcast %c0_i32_27 : i32 to vector<1x256xi32>
    %100 = arith.cmpi sge, %98, %99 : vector<1x256xi32>
    %c4_i32_28 = arith.constant 4 : i32
    %101 = vector.broadcast %c4_i32_28 : i32 to vector<1x256xi32>
    %102 = arith.addi %19, %101 : vector<1x256xi32>
    %c16_i32_29 = arith.constant 16 : i32
    %103 = vector.broadcast %c16_i32_29 : i32 to vector<1x256xi32>
    %104 = arith.cmpi slt, %102, %103 : vector<1x256xi32>
    %105 = arith.andi %100, %104 : vector<1x256xi1>
    %106 = arith.extui %105 : vector<1x256xi1> to vector<1x256xi32>
    %107 = arith.sitofp %106 : vector<1x256xi32> to vector<1x256xf32>
    %c0_30 = arith.constant 0 : index
    %c0_31 = arith.constant 0 : index
    %c0_32 = arith.constant 0 : index
    %108 = vector.load %arg1[%c0_30, %c0_31, %c0_32] : memref<1x32x256xf32, #tpu.memory_space<vmem>>, vector<1x32x256xf32>
    %109 = vector.shape_cast %108 : vector<1x32x256xf32> to vector<32x256xf32>
    %c0_33 = arith.constant 0 : index
    %c0_34 = arith.constant 0 : index
    %110 = vector.load %arg2[%c0_33, %c0_34] : memref<8x32xf32, #tpu.memory_space<vmem>>, vector<8x32xf32>
    %cst_35 = arith.constant dense<0.000000e+00> : vector<8x256xf32>
    %111 = tpu.matmul %110, %109, %cst_35 {dimension_numbers = #tpu.dot_dimension_numbers<[1], [0], [0], [1], [0, 0, 1, 1], [], []>} : vector<8x32xf32>, vector<32x256xf32>, vector<8x256xf32> -> vector<8x256xf32>
    %c0_36 = arith.constant 0 : index
    %c0_37 = arith.constant 0 : index
    %112 = vector.load %arg3[%c0_36, %c0_37] : memref<8x1xf32, #tpu.memory_space<vmem>>, vector<8x1xf32>
    %113 = vector.broadcast %112 : vector<8x1xf32> to vector<8x256xf32>
    %114 = arith.addf %111, %113 : vector<8x256xf32>
    %cst_38 = arith.constant 0.000000e+00 : f32
    %115 = vector.broadcast %cst_38 : f32 to vector<8x256xf32>
    %116 = arith.maximumf %114, %115 : vector<8x256xf32>
    %c0_39 = arith.constant 0 : index
    %c128 = arith.constant 128 : index
    %117 = vector.load %arg12[%c0_39, %c128] : memref<8x512xf32, #tpu.memory_space<vmem>>, vector<8x256xf32>
    tpu.vector_store %arg12[%c0_39, %c128], %116 {strides = array<i32>} : memref<8x512xf32, #tpu.memory_space<vmem>>, vector<8x256xf32>,
    %cst_40 = arith.constant 0.000000e+00 : f32
    %118 = vector.broadcast %cst_40 : f32 to vector<4x256xf32>
    %cst_41 = arith.constant 0.000000e+00 : f32
    %119 = vector.broadcast %cst_41 : f32 to vector<4x256xf32>
    %c0_42 = arith.constant 0 : index
    %c124 = arith.constant 124 : index
    %120 = vector.load %arg12[%c0_42, %c124] : memref<8x512xf32, #tpu.memory_space<vmem>>, vector<8x256xf32>
    %c0_43 = arith.constant 0 : index
    %c0_44 = arith.constant 0 : index
    %c0_45 = arith.constant 0 : index
    %121 = vector.load %arg4[%c0_43, %c0_44, %c0_45] : memref<9x4x8xf32, #tpu.memory_space<vmem>>, vector<1x4x8xf32>
    %122 = vector.shape_cast %121 : vector<1x4x8xf32> to vector<4x8xf32>
    %cst_46 = arith.constant dense<0.000000e+00> : vector<4x256xf32>
    %123 = tpu.matmul %122, %120, %cst_46 {dimension_numbers = #tpu.dot_dimension_numbers<[1], [0], [0], [1], [0, 0, 1, 1], [], []>} : vector<4x8xf32>, vector<8x256xf32>, vector<4x256xf32> -> vector<4x256xf32>
    %124 = vector.broadcast %30 : vector<1x256xf32> to vector<4x256xf32>
    %125 = arith.mulf %123, %124 : vector<4x256xf32>
    %126 = arith.addf %118, %125 : vector<4x256xf32>
    %c0_47 = arith.constant 0 : index
    %c64 = arith.constant 64 : index
    %127 = vector.load %arg12[%c0_47, %c64] : memref<8x512xf32, #tpu.memory_space<vmem>>, vector<8x256xf32>
    %c0_48 = arith.constant 0 : index
    %c0_49 = arith.constant 0 : index
    %c0_50 = arith.constant 0 : index
    %128 = vector.load %arg5[%c0_48, %c0_49, %c0_50] : memref<9x4x8xf32, #tpu.memory_space<vmem>>, vector<1x4x8xf32>
    %129 = vector.shape_cast %128 : vector<1x4x8xf32> to vector<4x8xf32>
    %cst_51 = arith.constant dense<0.000000e+00> : vector<4x256xf32>
    %130 = tpu.matmul %129, %127, %cst_51 {dimension_numbers = #tpu.dot_dimension_numbers<[1], [0], [0], [1], [0, 0, 1, 1], [], []>} : vector<4x8xf32>, vector<8x256xf32>, vector<4x256xf32> -> vector<4x256xf32>
    %131 = arith.addf %119, %130 : vector<4x256xf32>
    %c0_52 = arith.constant 0 : index
    %c125 = arith.constant 125 : index
    %132 = vector.load %arg12[%c0_52, %c125] : memref<8x512xf32, #tpu.memory_space<vmem>>, vector<8x256xf32>
    %c1 = arith.constant 1 : index
    %c0_53 = arith.constant 0 : index
    %c0_54 = arith.constant 0 : index
    %133 = vector.load %arg4[%c1, %c0_53, %c0_54] : memref<9x4x8xf32, #tpu.memory_space<vmem>>, vector<1x4x8xf32>
    %134 = vector.shape_cast %133 : vector<1x4x8xf32> to vector<4x8xf32>
    %cst_55 = arith.constant dense<0.000000e+00> : vector<4x256xf32>
    %135 = tpu.matmul %134, %132, %cst_55 {dimension_numbers = #tpu.dot_dimension_numbers<[1], [0], [0], [1], [0, 0, 1, 1], [], []>} : vector<4x8xf32>, vector<8x256xf32>, vector<4x256xf32> -> vector<4x256xf32>
    %136 = vector.broadcast %41 : vector<1x256xf32> to vector<4x256xf32>
    %137 = arith.mulf %135, %136 : vector<4x256xf32>
    %138 = arith.addf %126, %137 : vector<4x256xf32>
    %c0_56 = arith.constant 0 : index
    %c80 = arith.constant 80 : index
    %139 = vector.load %arg12[%c0_56, %c80] : memref<8x512xf32, #tpu.memory_space<vmem>>, vector<8x256xf32>
    %c1_57 = arith.constant 1 : index
    %c0_58 = arith.constant 0 : index
    %c0_59 = arith.constant 0 : index
    %140 = vector.load %arg5[%c1_57, %c0_58, %c0_59] : memref<9x4x8xf32, #tpu.memory_space<vmem>>, vector<1x4x8xf32>
    %141 = vector.shape_cast %140 : vector<1x4x8xf32> to vector<4x8xf32>
    %cst_60 = arith.constant dense<0.000000e+00> : vector<4x256xf32>
    %142 = tpu.matmul %141, %139, %cst_60 {dimension_numbers = #tpu.dot_dimension_numbers<[1], [0], [0], [1], [0, 0, 1, 1], [], []>} : vector<4x8xf32>, vector<8x256xf32>, vector<4x256xf32> -> vector<4x256xf32>
    %143 = arith.addf %131, %142 : vector<4x256xf32>
    %c0_61 = arith.constant 0 : index
    %c126 = arith.constant 126 : index
    %144 = vector.load %arg12[%c0_61, %c126] : memref<8x512xf32, #tpu.memory_space<vmem>>, vector<8x256xf32>
    %c2 = arith.constant 2 : index
    %c0_62 = arith.constant 0 : index
    %c0_63 = arith.constant 0 : index
    %145 = vector.load %arg4[%c2, %c0_62, %c0_63] : memref<9x4x8xf32, #tpu.memory_space<vmem>>, vector<1x4x8xf32>
    %146 = vector.shape_cast %145 : vector<1x4x8xf32> to vector<4x8xf32>
    %cst_64 = arith.constant dense<0.000000e+00> : vector<4x256xf32>
    %147 = tpu.matmul %146, %144, %cst_64 {dimension_numbers = #tpu.dot_dimension_numbers<[1], [0], [0], [1], [0, 0, 1, 1], [], []>} : vector<4x8xf32>, vector<8x256xf32>, vector<4x256xf32> -> vector<4x256xf32>
    %148 = vector.broadcast %52 : vector<1x256xf32> to vector<4x256xf32>
    %149 = arith.mulf %147, %148 : vector<4x256xf32>
    %150 = arith.addf %138, %149 : vector<4x256xf32>
    %c0_65 = arith.constant 0 : index
    %c96 = arith.constant 96 : index
    %151 = vector.load %arg12[%c0_65, %c96] : memref<8x512xf32, #tpu.memory_space<vmem>>, vector<8x256xf32>
    %c2_66 = arith.constant 2 : index
    %c0_67 = arith.constant 0 : index
    %c0_68 = arith.constant 0 : index
    %152 = vector.load %arg5[%c2_66, %c0_67, %c0_68] : memref<9x4x8xf32, #tpu.memory_space<vmem>>, vector<1x4x8xf32>
    %153 = vector.shape_cast %152 : vector<1x4x8xf32> to vector<4x8xf32>
    %cst_69 = arith.constant dense<0.000000e+00> : vector<4x256xf32>
    %154 = tpu.matmul %153, %151, %cst_69 {dimension_numbers = #tpu.dot_dimension_numbers<[1], [0], [0], [1], [0, 0, 1, 1], [], []>} : vector<4x8xf32>, vector<8x256xf32>, vector<4x256xf32> -> vector<4x256xf32>
    %155 = arith.addf %143, %154 : vector<4x256xf32>
    %c0_70 = arith.constant 0 : index
    %c127 = arith.constant 127 : index
    %156 = vector.load %arg12[%c0_70, %c127] : memref<8x512xf32, #tpu.memory_space<vmem>>, vector<8x256xf32>
    %c3 = arith.constant 3 : index
    %c0_71 = arith.constant 0 : index
    %c0_72 = arith.constant 0 : index
    %157 = vector.load %arg4[%c3, %c0_71, %c0_72] : memref<9x4x8xf32, #tpu.memory_space<vmem>>, vector<1x4x8xf32>
    %158 = vector.shape_cast %157 : vector<1x4x8xf32> to vector<4x8xf32>
    %cst_73 = arith.constant dense<0.000000e+00> : vector<4x256xf32>
    %159 = tpu.matmul %158, %156, %cst_73 {dimension_numbers = #tpu.dot_dimension_numbers<[1], [0], [0], [1], [0, 0, 1, 1], [], []>} : vector<4x8xf32>, vector<8x256xf32>, vector<4x256xf32> -> vector<4x256xf32>
    %160 = vector.broadcast %63 : vector<1x256xf32> to vector<4x256xf32>
    %161 = arith.mulf %159, %160 : vector<4x256xf32>
    %162 = arith.addf %150, %161 : vector<4x256xf32>
    %c0_74 = arith.constant 0 : index
    %c112 = arith.constant 112 : index
    %163 = vector.load %arg12[%c0_74, %c112] : memref<8x512xf32, #tpu.memory_space<vmem>>, vector<8x256xf32>
    %c3_75 = arith.constant 3 : index
    %c0_76 = arith.constant 0 : index
    %c0_77 = arith.constant 0 : index
    %164 = vector.load %arg5[%c3_75, %c0_76, %c0_77] : memref<9x4x8xf32, #tpu.memory_space<vmem>>, vector<1x4x8xf32>
    %165 = vector.shape_cast %164 : vector<1x4x8xf32> to vector<4x8xf32>
    %cst_78 = arith.constant dense<0.000000e+00> : vector<4x256xf32>
    %166 = tpu.matmul %165, %163, %cst_78 {dimension_numbers = #tpu.dot_dimension_numbers<[1], [0], [0], [1], [0, 0, 1, 1], [], []>} : vector<4x8xf32>, vector<8x256xf32>, vector<4x256xf32> -> vector<4x256xf32>
    %167 = arith.addf %155, %166 : vector<4x256xf32>
    %c4 = arith.constant 4 : index
    %c0_79 = arith.constant 0 : index
    %c0_80 = arith.constant 0 : index
    %168 = vector.load %arg4[%c4, %c0_79, %c0_80] : memref<9x4x8xf32, #tpu.memory_space<vmem>>, vector<1x4x8xf32>
    %169 = vector.shape_cast %168 : vector<1x4x8xf32> to vector<4x8xf32>
    %cst_81 = arith.constant dense<0.000000e+00> : vector<4x256xf32>
    %170 = tpu.matmul %169, %116, %cst_81 {dimension_numbers = #tpu.dot_dimension_numbers<[1], [0], [0], [1], [0, 0, 1, 1], [], []>} : vector<4x8xf32>, vector<8x256xf32>, vector<4x256xf32> -> vector<4x256xf32>
    %171 = arith.addf %162, %170 : vector<4x256xf32>
    %c4_82 = arith.constant 4 : index
    %c0_83 = arith.constant 0 : index
    %c0_84 = arith.constant 0 : index
    %172 = vector.load %arg5[%c4_82, %c0_83, %c0_84] : memref<9x4x8xf32, #tpu.memory_space<vmem>>, vector<1x4x8xf32>
    %173 = vector.shape_cast %172 : vector<1x4x8xf32> to vector<4x8xf32>
    %cst_85 = arith.constant dense<0.000000e+00> : vector<4x256xf32>
    %174 = tpu.matmul %173, %116, %cst_85 {dimension_numbers = #tpu.dot_dimension_numbers<[1], [0], [0], [1], [0, 0, 1, 1], [], []>} : vector<4x8xf32>, vector<8x256xf32>, vector<4x256xf32> -> vector<4x256xf32>
    %175 = arith.addf %167, %174 : vector<4x256xf32>
    %c0_86 = arith.constant 0 : index
    %c129 = arith.constant 129 : index
    %176 = vector.load %arg12[%c0_86, %c129] : memref<8x512xf32, #tpu.memory_space<vmem>>, vector<8x256xf32>
    %c5 = arith.constant 5 : index
    %c0_87 = arith.constant 0 : index
    %c0_88 = arith.constant 0 : index
    %177 = vector.load %arg4[%c5, %c0_87, %c0_88] : memref<9x4x8xf32, #tpu.memory_space<vmem>>, vector<1x4x8xf32>
    %178 = vector.shape_cast %177 : vector<1x4x8xf32> to vector<4x8xf32>
    %cst_89 = arith.constant dense<0.000000e+00> : vector<4x256xf32>
    %179 = tpu.matmul %178, %176, %cst_89 {dimension_numbers = #tpu.dot_dimension_numbers<[1], [0], [0], [1], [0, 0, 1, 1], [], []>} : vector<4x8xf32>, vector<8x256xf32>, vector<4x256xf32> -> vector<4x256xf32>
    %180 = vector.broadcast %74 : vector<1x256xf32> to vector<4x256xf32>
    %181 = arith.mulf %179, %180 : vector<4x256xf32>
    %182 = arith.addf %171, %181 : vector<4x256xf32>
    %c0_90 = arith.constant 0 : index
    %c144 = arith.constant 144 : index
    %183 = vector.load %arg12[%c0_90, %c144] : memref<8x512xf32, #tpu.memory_space<vmem>>, vector<8x256xf32>
    %c5_91 = arith.constant 5 : index
    %c0_92 = arith.constant 0 : index
    %c0_93 = arith.constant 0 : index
    %184 = vector.load %arg5[%c5_91, %c0_92, %c0_93] : memref<9x4x8xf32, #tpu.memory_space<vmem>>, vector<1x4x8xf32>
    %185 = vector.shape_cast %184 : vector<1x4x8xf32> to vector<4x8xf32>
    %cst_94 = arith.constant dense<0.000000e+00> : vector<4x256xf32>
    %186 = tpu.matmul %185, %183, %cst_94 {dimension_numbers = #tpu.dot_dimension_numbers<[1], [0], [0], [1], [0, 0, 1, 1], [], []>} : vector<4x8xf32>, vector<8x256xf32>, vector<4x256xf32> -> vector<4x256xf32>
    %187 = arith.addf %175, %186 : vector<4x256xf32>
    %c0_95 = arith.constant 0 : index
    %c130 = arith.constant 130 : index
    %188 = vector.load %arg12[%c0_95, %c130] : memref<8x512xf32, #tpu.memory_space<vmem>>, vector<8x256xf32>
    %c6 = arith.constant 6 : index
    %c0_96 = arith.constant 0 : index
    %c0_97 = arith.constant 0 : index
    %189 = vector.load %arg4[%c6, %c0_96, %c0_97] : memref<9x4x8xf32, #tpu.memory_space<vmem>>, vector<1x4x8xf32>
    %190 = vector.shape_cast %189 : vector<1x4x8xf32> to vector<4x8xf32>
    %cst_98 = arith.constant dense<0.000000e+00> : vector<4x256xf32>
    %191 = tpu.matmul %190, %188, %cst_98 {dimension_numbers = #tpu.dot_dimension_numbers<[1], [0], [0], [1], [0, 0, 1, 1], [], []>} : vector<4x8xf32>, vector<8x256xf32>, vector<4x256xf32> -> vector<4x256xf32>
    %192 = vector.broadcast %85 : vector<1x256xf32> to vector<4x256xf32>
    %193 = arith.mulf %191, %192 : vector<4x256xf32>
    %194 = arith.addf %182, %193 : vector<4x256xf32>
    %c0_99 = arith.constant 0 : index
    %c160 = arith.constant 160 : index
    %195 = vector.load %arg12[%c0_99, %c160] : memref<8x512xf32, #tpu.memory_space<vmem>>, vector<8x256xf32>
    %c6_100 = arith.constant 6 : index
    %c0_101 = arith.constant 0 : index
    %c0_102 = arith.constant 0 : index
    %196 = vector.load %arg5[%c6_100, %c0_101, %c0_102] : memref<9x4x8xf32, #tpu.memory_space<vmem>>, vector<1x4x8xf32>
    %197 = vector.shape_cast %196 : vector<1x4x8xf32> to vector<4x8xf32>
    %cst_103 = arith.constant dense<0.000000e+00> : vector<4x256xf32>
    %198 = tpu.matmul %197, %195, %cst_103 {dimension_numbers = #tpu.dot_dimension_numbers<[1], [0], [0], [1], [0, 0, 1, 1], [], []>} : vector<4x8xf32>, vector<8x256xf32>, vector<4x256xf32> -> vector<4x256xf32>
    %199 = arith.addf %187, %198 : vector<4x256xf32>
    %c0_104 = arith.constant 0 : index
    %c131 = arith.constant 131 : index
    %200 = vector.load %arg12[%c0_104, %c131] : memref<8x512xf32, #tpu.memory_space<vmem>>, vector<8x256xf32>
    %c7 = arith.constant 7 : index
    %c0_105 = arith.constant 0 : index
    %c0_106 = arith.constant 0 : index
    %201 = vector.load %arg4[%c7, %c0_105, %c0_106] : memref<9x4x8xf32, #tpu.memory_space<vmem>>, vector<1x4x8xf32>
    %202 = vector.shape_cast %201 : vector<1x4x8xf32> to vector<4x8xf32>
    %cst_107 = arith.constant dense<0.000000e+00> : vector<4x256xf32>
    %203 = tpu.matmul %202, %200, %cst_107 {dimension_numbers = #tpu.dot_dimension_numbers<[1], [0], [0], [1], [0, 0, 1, 1], [], []>} : vector<4x8xf32>, vector<8x256xf32>, vector<4x256xf32> -> vector<4x256xf32>
    %204 = vector.broadcast %96 : vector<1x256xf32> to vector<4x256xf32>
    %205 = arith.mulf %203, %204 : vector<4x256xf32>
    %206 = arith.addf %194, %205 : vector<4x256xf32>
    %c0_108 = arith.constant 0 : index
    %c176 = arith.constant 176 : index
    %207 = vector.load %arg12[%c0_108, %c176] : memref<8x512xf32, #tpu.memory_space<vmem>>, vector<8x256xf32>
    %c7_109 = arith.constant 7 : index
    %c0_110 = arith.constant 0 : index
    %c0_111 = arith.constant 0 : index
    %208 = vector.load %arg5[%c7_109, %c0_110, %c0_111] : memref<9x4x8xf32, #tpu.memory_space<vmem>>, vector<1x4x8xf32>
    %209 = vector.shape_cast %208 : vector<1x4x8xf32> to vector<4x8xf32>
    %cst_112 = arith.constant dense<0.000000e+00> : vector<4x256xf32>
    %210 = tpu.matmul %209, %207, %cst_112 {dimension_numbers = #tpu.dot_dimension_numbers<[1], [0], [0], [1], [0, 0, 1, 1], [], []>} : vector<4x8xf32>, vector<8x256xf32>, vector<4x256xf32> -> vector<4x256xf32>
    %211 = arith.addf %199, %210 : vector<4x256xf32>
    %c0_113 = arith.constant 0 : index
    %c132 = arith.constant 132 : index
    %212 = vector.load %arg12[%c0_113, %c132] : memref<8x512xf32, #tpu.memory_space<vmem>>, vector<8x256xf32>
    %c8 = arith.constant 8 : index
    %c0_114 = arith.constant 0 : index
    %c0_115 = arith.constant 0 : index
    %213 = vector.load %arg4[%c8, %c0_114, %c0_115] : memref<9x4x8xf32, #tpu.memory_space<vmem>>, vector<1x4x8xf32>
    %214 = vector.shape_cast %213 : vector<1x4x8xf32> to vector<4x8xf32>
    %cst_116 = arith.constant dense<0.000000e+00> : vector<4x256xf32>
    %215 = tpu.matmul %214, %212, %cst_116 {dimension_numbers = #tpu.dot_dimension_numbers<[1], [0], [0], [1], [0, 0, 1, 1], [], []>} : vector<4x8xf32>, vector<8x256xf32>, vector<4x256xf32> -> vector<4x256xf32>
    %216 = vector.broadcast %107 : vector<1x256xf32> to vector<4x256xf32>
    %217 = arith.mulf %215, %216 : vector<4x256xf32>
    %218 = arith.addf %206, %217 : vector<4x256xf32>
    %c0_117 = arith.constant 0 : index
    %c192 = arith.constant 192 : index
    %219 = vector.load %arg12[%c0_117, %c192] : memref<8x512xf32, #tpu.memory_space<vmem>>, vector<8x256xf32>
    %c8_118 = arith.constant 8 : index
    %c0_119 = arith.constant 0 : index
    %c0_120 = arith.constant 0 : index
    %220 = vector.load %arg5[%c8_118, %c0_119, %c0_120] : memref<9x4x8xf32, #tpu.memory_space<vmem>>, vector<1x4x8xf32>
    %221 = vector.shape_cast %220 : vector<1x4x8xf32> to vector<4x8xf32>
    %cst_121 = arith.constant dense<0.000000e+00> : vector<4x256xf32>
    %222 = tpu.matmul %221, %219, %cst_121 {dimension_numbers = #tpu.dot_dimension_numbers<[1], [0], [0], [1], [0, 0, 1, 1], [], []>} : vector<4x8xf32>, vector<8x256xf32>, vector<4x256xf32> -> vector<4x256xf32>
    %223 = arith.addf %211, %222 : vector<4x256xf32>
    %c0_122 = arith.constant 0 : index
    %c0_123 = arith.constant 0 : index
    %224 = vector.load %arg6[%c0_122, %c0_123] : memref<4x1xf32, #tpu.memory_space<vmem>>, vector<4x1xf32>
    %225 = vector.broadcast %224 : vector<4x1xf32> to vector<4x256xf32>
    %226 = arith.addf %218, %225 : vector<4x256xf32>
    %cst_124 = arith.constant 0.000000e+00 : f32
    %227 = vector.broadcast %cst_124 : f32 to vector<4x256xf32>
    %228 = arith.maximumf %226, %227 : vector<4x256xf32>
    %c0_125 = arith.constant 0 : index
    %c0_126 = arith.constant 0 : index
    %229 = vector.load %arg7[%c0_125, %c0_126] : memref<4x1xf32, #tpu.memory_space<vmem>>, vector<4x1xf32>
    %230 = vector.broadcast %229 : vector<4x1xf32> to vector<4x256xf32>
    %231 = arith.addf %223, %230 : vector<4x256xf32>
    %cst_127 = arith.constant 0.000000e+00 : f32
    %232 = vector.broadcast %cst_127 : f32 to vector<4x256xf32>
    %233 = arith.maximumf %231, %232 : vector<4x256xf32>
    %c0_128 = arith.constant 0 : index
    %c0_129 = arith.constant 0 : index
    %234 = vector.load %arg8[%c0_128, %c0_129] : memref<16x4xf32, #tpu.memory_space<vmem>>, vector<16x4xf32>
    %cst_130 = arith.constant dense<0.000000e+00> : vector<16x256xf32>
    %235 = tpu.matmul %234, %228, %cst_130 {dimension_numbers = #tpu.dot_dimension_numbers<[1], [0], [0], [1], [0, 0, 1, 1], [], []>} : vector<16x4xf32>, vector<4x256xf32>, vector<16x256xf32> -> vector<16x256xf32>
    %c0_131 = arith.constant 0 : index
    %c0_132 = arith.constant 0 : index
    %236 = vector.load %arg9[%c0_131, %c0_132] : memref<16x4xf32, #tpu.memory_space<vmem>>, vector<16x4xf32>
    %cst_133 = arith.constant dense<0.000000e+00> : vector<16x256xf32>
    %237 = tpu.matmul %236, %233, %cst_133 {dimension_numbers = #tpu.dot_dimension_numbers<[1], [0], [0], [1], [0, 0, 1, 1], [], []>} : vector<16x4xf32>, vector<4x256xf32>, vector<16x256xf32> -> vector<16x256xf32>
    %238 = arith.addf %235, %237 : vector<16x256xf32>
    %c0_134 = arith.constant 0 : index
    %c0_135 = arith.constant 0 : index
    %239 = vector.load %arg10[%c0_134, %c0_135] : memref<16x1xf32, #tpu.memory_space<vmem>>, vector<16x1xf32>
    %240 = vector.broadcast %239 : vector<16x1xf32> to vector<16x256xf32>
    %241 = arith.addf %238, %240 : vector<16x256xf32>
    %cst_136 = arith.constant 0.000000e+00 : f32
    %242 = vector.broadcast %cst_136 : f32 to vector<16x256xf32>
    %243 = arith.maximumf %241, %242 : vector<16x256xf32>
    %c0_137 = arith.constant 0 : index
    %c0_138 = arith.constant 0 : index
    %c0_139 = arith.constant 0 : index
    %244 = vector.load %arg11[%c0_137, %c0_138, %c0_139] : memref<1x16x256xf32, #tpu.memory_space<vmem>>, vector<1x16x256xf32>
    %245 = vector.shape_cast %244 : vector<1x16x256xf32> to vector<16x256xf32>
    %246 = vector.shape_cast %243 : vector<16x256xf32> to vector<1x16x256xf32>
    tpu.vector_store %arg11[%c0_137, %c0_138, %c0_139], %246 {strides = array<i32>} : memref<1x16x256xf32, #tpu.memory_space<vmem>>, vector<1x16x256xf32>,
    return
  }
  func.func @transform_0(%arg0: i32) -> (i32, i32, i32) {
    %c0_i32 = arith.constant 0 : i32
    %c0_i32_0 = arith.constant 0 : i32
    %c0_i32_1 = arith.constant 0 : i32
    return %arg0, %c0_i32, %c0_i32_0 : i32, i32, i32
  }
  func.func @transform_1(%arg0: i32) -> (i32, i32) {
    %c0_i32 = arith.constant 0 : i32
    %c0_i32_0 = arith.constant 0 : i32
    %c0_i32_1 = arith.constant 0 : i32
    return %c0_i32, %c0_i32_0 : i32, i32
  }
  func.func @transform_2(%arg0: i32) -> (i32, i32) {
    %c0_i32 = arith.constant 0 : i32
    %c0_i32_0 = arith.constant 0 : i32
    %c0_i32_1 = arith.constant 0 : i32
    return %c0_i32, %c0_i32_0 : i32, i32
  }
  func.func @transform_3(%arg0: i32) -> (i32, i32, i32) {
    %c0_i32 = arith.constant 0 : i32
    %c0_i32_0 = arith.constant 0 : i32
    %c0_i32_1 = arith.constant 0 : i32
    %c0_i32_2 = arith.constant 0 : i32
    return %c0_i32, %c0_i32_0, %c0_i32_1 : i32, i32, i32
  }
  func.func @transform_4(%arg0: i32) -> (i32, i32, i32) {
    %c0_i32 = arith.constant 0 : i32
    %c0_i32_0 = arith.constant 0 : i32
    %c0_i32_1 = arith.constant 0 : i32
    %c0_i32_2 = arith.constant 0 : i32
    return %c0_i32, %c0_i32_0, %c0_i32_1 : i32, i32, i32
  }
  func.func @transform_5(%arg0: i32) -> (i32, i32) {
    %c0_i32 = arith.constant 0 : i32
    %c0_i32_0 = arith.constant 0 : i32
    %c0_i32_1 = arith.constant 0 : i32
    return %c0_i32, %c0_i32_0 : i32, i32
  }
  func.func @transform_6(%arg0: i32) -> (i32, i32) {
    %c0_i32 = arith.constant 0 : i32
    %c0_i32_0 = arith.constant 0 : i32
    %c0_i32_1 = arith.constant 0 : i32
    return %c0_i32, %c0_i32_0 : i32, i32
  }
  func.func @transform_7(%arg0: i32) -> (i32, i32) {
    %c0_i32 = arith.constant 0 : i32
    %c0_i32_0 = arith.constant 0 : i32
    %c0_i32_1 = arith.constant 0 : i32
    return %c0_i32, %c0_i32_0 : i32, i32
  }
  func.func @transform_8(%arg0: i32) -> (i32, i32) {
    %c0_i32 = arith.constant 0 : i32
    %c0_i32_0 = arith.constant 0 : i32
    %c0_i32_1 = arith.constant 0 : i32
    return %c0_i32, %c0_i32_0 : i32, i32
  }
  func.func @transform_9(%arg0: i32) -> (i32, i32) {
    %c0_i32 = arith.constant 0 : i32
    %c0_i32_0 = arith.constant 0 : i32
    %c0_i32_1 = arith.constant 0 : i32
    return %c0_i32, %c0_i32_0 : i32, i32
  }
  func.func @transform_10(%arg0: i32) -> (i32, i32, i32) {
    %c0_i32 = arith.constant 0 : i32
    %c0_i32_0 = arith.constant 0 : i32
    %c0_i32_1 = arith.constant 0 : i32
    return %arg0, %c0_i32, %c0_i32_0 : i32, i32, i32
  }
}

</mosaic_0001>

<bundles_post_ra>
// kernel: decoder_block_1dconv2.1
= control target key start
LH: loop header
LB: loop body
LE: loop exit
PB: predicated region body
PF: predicated region fallthrough
CT: control target
= control target key end

     0   :  { %s2094_s13 = smov 0   ;;  %s2365_s0 = inlined_call_operand.vmem [shape: f32[2,32,256], index: 0, kind: input, shape index: {}]   ;;  %s2366_s1 = inlined_call_operand.vmem [shape: f32[8,32], index: 1, kind: input, shape index: {}]   ;;  %s2367_s2 = inlined_call_operand.vmem [shape: f32[8,1], index: 2, kind: input, shape index: {}]   ;;  %s2368_s3 = inlined_call_operand.vmem [shape: f32[9,4,8], index: 3, kind: input, shape index: {}]   ;;  %s2369_s4 = inlined_call_operand.vmem [shape: f32[9,4,8], index: 4, kind: input, shape index: {}]   ;;  %s2370_s5 = inlined_call_operand.vmem [shape: f32[4,1], index: 5, kind: input, shape index: {}]   ;;  %s2371_s6 = inlined_call_operand.vmem [shape: f32[4,1], index: 6, kind: input, shape index: {}]   ;;  %s2372_s7 = inlined_call_operand.vmem [shape: f32[16,4], index: 7, kind: input, shape index: {}]   ;;  %s2373_s8 = inlined_call_operand.vmem [shape: f32[16,4], index: 8, kind: input, shape index: {}]   ;;  %s2374_s9 = inlined_call_operand.vmem [shape: f32[16,1], index: 9, kind: input, shape index: {}]   ;;  %s2375_s10 = inlined_call_operand.vmem [shape: f32[2,16,256], index: 10, kind: output, shape index: {}]  }
   0x1 LB: > { %s1811_s14 = sadd.s32 4294967295, %s2020_s13   ;;  %p1815_p0 = scmp.ge.s32.totalorder %s2020_s13, 1  ;;  %s2020_s13 = sphi %s2094_s13, %s20_s13  }
   0x2   : > { %p312_p1 = scmp.lt.s32.totalorder %s2020_s13, 3 }
   0x4   : > { %p313_p2 = pnand %p1815_p0, %p312_p1 }
   0x5   : > { %p350_p3 = scmp.lt.s32.totalorder (!%p313_p2), %s1811_s14, 1  ;;  %s2023_s23 = smov (!%p313_p2), 3  }
   0x6   : > { %316 = sbr.rel (%p313_p2) target bundleno = 632 (0x278), region = 60  ;;  %s2024_s24 = smov (!%p313_p2), 4  }
   0x7   : > { %s2026_s25 = smov (!%p313_p2), 48   ;;  %s2027_s26 = smov (!%p313_p2), 64  }
   0x8   : > { %s2028_s27 = smov (!%p313_p2), 2   ;;  %s2029_s28 = smov (!%p313_p2), 32  }
   0x9   : > { %s2030_s29 = smov (!%p313_p2), 1   ;;  %s2031_s30 = smov (!%p313_p2), 16  }
   0xa   : > { %s2032_s11 = smov (!%p313_p2), 112   ;;  %s2033_s12 = smov (!%p313_p2), 127  }
   0xb   : > { %v494_v0 = vld [vmem:[%s2367_s2] sm:$0xff]  ;;  %v2022_v1 = vmov 0   ;;  %s2377_s14 = smov (!%p350_p3, %s1811_s14), 1  ;;  %vm500_vm0 = vcmask 261120   ;;  %v2025_v18 = vmov 0.0   ;;  %s2034_s15 = smov 126  }
   0xc   : > { %1931 = vset.pattern.permute.xlu0 %v2022_v1  ;;  %2012 = vset.pattern.permute.xlu1 %v2022_v1  ;;  %s1904_s17 = sshll.u32 %s2377_s14, 6  ;;  %v493_v10 = vld [vmem:[%s2366_s1] sm:$0xff]  ;;  %s2035_s16 = smov 96   ;;  %v1733_v22 = vld [vmem:[%s2374_s9 + $0x8] sm:$0xff]  ;;  %vm683_vm1 = vcmask 392192   ;;  %vm566_vm2 = vcmask 64512  }
   0xd   : > { %497 = vperm.xlu0 %1931, %v494_v0   ;;  %2013 = vset.pattern.permute.xlu2 %v2022_v1  ;;  %s354_s20 = scalar_lea.vmem %s2365_s0, %s1904_s17  ;;  %s2036_s17 = smov 125   ;;  %v1591_v21 = vld [vmem:[%s2370_s5] sm:$0xf]  ;;  %v1843_v27 = vld [vmem:[%s2369_s4 + $0x4] sm:$0xf]  ;;  %vm561_vm3 = vcmask 31744  }
   0xe   : > { %v491_v2 = vld [vmem:[%s354_s20 + $0x30] sm:$0xff]  ;;  %v492_v3 = vld [vmem:[%s354_s20 + $0x38] sm:$0xff]  ;;  %v489_v4 = vld [vmem:[%s354_s20 + $0x20] sm:$0xff]  ;;  %s2037_s18 = smov 80   ;;  %s2038_s19 = smov 124   ;;  %vm623_vm4 = vcmask 23552  }
   0xf   : > { %516 = vmatpush.msra.mxu0 %v491_v2  ;;  %536 = vmatpush.msra.mxu1 %v492_v3  ;;  %v490_v5 = vld [vmem:[%s354_s20 + $0x28] sm:$0xff]  ;;  %v487_v6 = vld [vmem:[%s354_s20 + $0x10] sm:$0xff]  ;;  %v488_v7 = vld [vmem:[%s354_s20 + $0x18] sm:$0xff]  ;;  %vm737_vm5 = vcmask 523264   ;;  %vm793_vm6 = vcmask 15360   ;;  %vm910_vm7 = vcmask 7168  }
  0x10   : > { %v485_v8 = vld [vmem:[%s354_s20] sm:$0xff]  ;;  %v486_v9 = vld [vmem:[%s354_s20 + $0x8] sm:$0xff]  ;;  %vm970_vm8 = vcmask 130048   ;;  %vm1128_vm9 = vcmask 1039360   ;;  %vm1188_vm10 = vcmask 916480   ;;  %vm1306_vm11 = vcmask 785408  }
  0x11   : > { %517 = vmatpush.msra.mxu0 %v489_v4  ;;  %537 = vmatpush.msra.mxu1 %v490_v5  ;;  %v551_v35 = vld [vmem:[%s2368_s3] sm:$0xf]  ;;  %v1840_v46 = vld [vmem:[%s2368_s3 + $0x4] sm:$0xf]  ;;  %v1848_v61 = vld [vmem:[%s2368_s3 + $0x8] sm:$0xf] }
  0x12   : > { %v614_v58 = vld [vmem:[%s2369_s4] sm:$0xf]  ;;  %v1851_v2 = vld [vmem:[%s2369_s4 + $0x8] sm:$0xf]  ;;  %vm1246_vm12 = vcmask 1031168   ;;  %vm1364_vm13 = vcmask 1022976  }
  0x13   : > { %518 = vmatpush.msra.mxu0 %v487_v6  ;;  %538 = vmatpush.msra.mxu1 %v488_v7  ;;  %vm1482_vm14 = vcmask 1014784   ;;  %vm1424_vm15 = vcmask 654336  }
  0x15   : > { %519 = vmatpush.msra.mxu0 %v485_v8  ;;  %539 = vmatpush.msra.mxu1 %v486_v9 }
  0x16   : > { %1836 = vmatmul.msk.f32.vlgmr.msra.gmra.mxu0 %vm500_vm0, %v493_v10  ;;  %1837 = vmatmul.msk.f32.vlgmr.msra.gmra.mxu1 %vm500_vm0, %v493_v10  ;;  %v1854_v10 = vld [vmem:[%s2368_s3 + $0xc] sm:$0xf] }
  0x7f   : > { %v498_v11 = vpop.permute.xlu0 %497 }
  0x93   : > { %v521_v12 = vpop.f32.mrf.mxu0  ;;  %v541_v13 = vpop.f32.mrf.mxu1 }
  0x94   : > { %v522_v14 = vadd.f32 %v521_v12, %v498_v11  ;;  %v542_v15 = vadd.f32 %v541_v13, %v498_v11 }
  0x96   : > { %v2116_v16 = vmax.f32 %v522_v14, 0.0  ;;  %v2118_v17 = vmax.f32 %v542_v15, 0.0 }
  0x98   : > { %621 = vrot.lane.b32.xlu2 %v2118_v17, %s2023_s23  ;;  %559 = vrot.lane.b32.xlu1 %v2118_v17, %s2024_s24  ;;  %v1932_v19 = vpack.i.bf16 %v2116_v16, %v2025_v18  ;;  %v1972_v20 = vpack.i.bf16 %v2118_v17, %v2116_v16 }
  0x9a   : > { %1933 = vrot.lane.b32.xlu0 %v1932_v19, %s2024_s24 }
  0xa0   : > { %1943 = vrot.lane.b32.xlu2 %v1932_v19, %s2026_s25  ;;  %1938 = vrot.lane.b32.xlu1 %v1932_v19, %s2023_s23 }
  0xa2   : > { %681 = vrot.lane.b32.xlu0 %v2118_v17, %s2026_s25 }
  0xa8   : > { %735 = vrot.lane.b32.xlu2 %v2118_v17, %s2027_s26  ;;  %1948 = vrot.lane.b32.xlu1 %v1932_v19, %s2027_s26 }
  0xaa   : > { %1953 = vrot.lane.b32.xlu0 %v1932_v19, %s2028_s27 }
  0xb0   : > { %1958 = vrot.lane.b32.xlu2 %v1932_v19, %s2029_s28  ;;  %791 = vrot.lane.b32.xlu1 %v2118_v17, %s2028_s27 }
  0xb2   : > { %851 = vrot.lane.b32.xlu0 %v2118_v17, %s2029_s28 }
  0xb8   : > { %908 = vrot.lane.b32.xlu2 %v2118_v17, %s2030_s29  ;;  %1963 = vrot.lane.b32.xlu1 %v1932_v19, %s2030_s29 }
  0xba   : > { %1968 = vrot.lane.b32.xlu0 %v1932_v19, %s2031_s30  ;;  %v1857_v19 = vld [vmem:[%s2369_s4 + $0xc] sm:$0xf] }
  0xc0   : > { %1186 = vrot.lane.b32.xlu2 %v2025_v18, %s2032_s11  ;;  %968 = vrot.lane.b32.xlu1 %v2118_v17, %s2031_s30 }
  0xc2   : > { %1126 = vrot.lane.b32.xlu0 %v2025_v18, %s2033_s12 }
  0xc8   : > { %1973 = vrot.lane.b32.xlu2 %v1972_v20, %s2033_s12  ;;  %1244 = vrot.lane.b32.xlu1 %v2025_v18, %s2034_s15 }
  0xca   : > { %1304 = vrot.lane.b32.xlu0 %v2025_v18, %s2035_s16 }
  0xd0   : > { %1362 = vrot.lane.b32.xlu2 %v2025_v18, %s2036_s17  ;;  %1978 = vrot.lane.b32.xlu1 %v1972_v20, %s2032_s11 }
  0xd2   : > { %1983 = vrot.lane.b32.xlu0 %v1972_v20, %s2034_s15 }
  0xd8   : > { %1988 = vrot.lane.b32.xlu2 %v1972_v20, %s2035_s16  ;;  %1993 = vrot.lane.b32.xlu1 %v1972_v20, %s2036_s17 }
  0xda   : > { %1998 = vrot.lane.b32.xlu0 %v1972_v20, %s2037_s18 }
  0xe0   : > { %2003 = vrot.lane.b32.xlu2 %v1972_v20, %s2038_s19  ;;  %1422 = vrot.lane.b32.xlu1 %v2025_v18, %s2037_s18  ;;  %s1905_s18 = sshll.u32 %s2377_s14, 5 }
  0xe1   : > { %s359_s21 = scalar_lea.vmem %s2375_s10, %s1905_s18 }
  0xe2   : > { %1480 = vrot.lane.b32.xlu0 %v2025_v18, %s2038_s19 }
  0xe8   : > { %2008 = vrot.lane.b32.xlu1 %v1972_v20, %s2027_s26  ;;  %1540 = vrot.lane.b32.xlu2 %v2025_v18, %s2027_s26 }
  0xea   : > { %1594 = vperm.xlu0 %1931, %v1591_v21  }
  0xf2   : > { %v622_v23 = vpop.permute.xlu2 %621  ;;  %1741 = vperm.xlu0 %1931, %v1733_v22  }
  0xfa   : > { %v1944_v24 = vpop.permute.xlu2 %1943 }
  0xfb   : > { %v1946_v25 = vunpack.i.h.bf16 %v1944_v24  ;;  %v1945_v26 = vunpack.i.l.bf16 %v1944_v24 }
  0xfd   : > { %v684_v28 = vsel %vm683_vm1, %v1945_v26, %v1946_v25 }
  0xfe   : > { %706 = vmatpush.msrb.mxu0 %v684_v28 }
  0xff   : > { %1844 = vmatmul.msk.f32.vlgmr.msrb.gmra.mxu0 %vm566_vm2, %v1843_v27 }
 0x102   : > { %v736_v29 = vpop.permute.xlu2 %735 }
 0x10a   : > { %v560_v30 = vpop.permute.xlu1 %559  ;;  %v1959_v31 = vpop.permute.xlu2 %1958 }
 0x10b   : > { %v1961_v47 = vunpack.i.h.bf16 %v1959_v31  ;;  %v1960_v48 = vunpack.i.l.bf16 %v1959_v31 }
 0x10c   : > { %v1934_v32 = vpop.permute.xlu0 %1933 }
 0x10d   : > { %v1936_v33 = vunpack.i.h.bf16 %v1934_v32  ;;  %v1935_v34 = vunpack.i.l.bf16 %v1934_v32  ;;  %v853_v57 = vsel %vm500_vm0, %v1960_v48, %v1961_v47 }
 0x10f   : > { %v562_v36 = vsel %vm561_vm3, %v1935_v34, %v1936_v33  ;;  %v563_v37 = vsel %vm561_vm3, %v1936_v33, %v560_v30 }
 0x110   : > { %585 = vmatpush.msra.mxu2 %v562_v36  ;;  %605 = vmatpush.msra.mxu3 %v563_v37  ;;  %v1869_v36 = vld [vmem:[%s2369_s4 + $0x14] sm:$0xf]  ;;  %v1601_v37 = vld [vmem:[%s2371_s6] sm:$0xf] }
 0x111   : > { %1838 = vmatmul.msk.f32.vlgmr.msra.gmra.mxu2 %vm566_vm2, %v551_v35  ;;  %1839 = vmatmul.msk.f32.vlgmr.msra.gmra.mxu3 %vm566_vm2, %v551_v35 }
 0x112   : > { %v1939_v38 = vpop.permute.xlu1 %1938  ;;  %v909_v42 = vpop.permute.xlu2 %908  ;;  %1604 = vperm.xlu1 %2012, %v1601_v37  }
 0x113   : > { %v1941_v39 = vunpack.i.h.bf16 %v1939_v38  ;;  %v1940_v40 = vunpack.i.l.bf16 %v1939_v38 }
 0x114   : > { %v682_v41 = vpop.permute.xlu0 %681 }
 0x115   : > { %v624_v43 = vsel %vm623_vm4, %v1940_v40, %v1941_v39  ;;  %v625_v44 = vsel %vm623_vm4, %v1941_v39, %v622_v23  ;;  %v685_v45 = vsel %vm683_vm1, %v1946_v25, %v682_v41  ;;  %v1860_v25 = vld [vmem:[%s2368_s3 + $0x10] sm:$0xf] }
 0x116   : > { %646 = vmatpush.msrb.mxu2 %v624_v43  ;;  %666 = vmatpush.msrb.mxu3 %v625_v44 }
 0x117   : > { %726 = vmatpush.msrb.mxu1 %v685_v45 }
 0x118   : > { %1845 = vmatmul.msk.f32.vlgmr.msrb.gmra.mxu1 %vm566_vm2, %v1843_v27 }
 0x119   : > { %1841 = vmatmul.msk.f32.vlgmr.msrb.gmra.mxu2 %vm566_vm2, %v1840_v46  ;;  %1842 = vmatmul.msk.f32.vlgmr.msrb.gmra.mxu3 %vm566_vm2, %v1840_v46  ;;  %v1872_v46 = vld [vmem:[%s2368_s3 + $0x18] sm:$0xf] }
 0x11a   : > { %v1949_v49 = vpop.permute.xlu1 %1948  ;;  %v2175_v59 = vpop.permute.xlu2 %1186 }
 0x11b   : > { %v1951_v50 = vunpack.i.h.bf16 %v1949_v49  ;;  %v1950_v51 = vunpack.i.l.bf16 %v1949_v49 }
 0x11c   : > { %v1954_v52 = vpop.permute.xlu0 %1953 }
 0x11d   : > { %v1956_v53 = vunpack.i.h.bf16 %v1954_v52  ;;  %v1955_v54 = vunpack.i.l.bf16 %v1954_v52  ;;  %v738_v55 = vsel %vm737_vm5, %v1950_v51, %v1951_v50  ;;  %v739_v56 = vsel %vm737_vm5, %v1951_v50, %v736_v29  ;;  %v1866_v29 = vld [vmem:[%s2368_s3 + $0x14] sm:$0xf] }
 0x11e   : > { %760 = vmatpush.msra.mxu2 %v738_v55  ;;  %780 = vmatpush.msra.mxu3 %v739_v56 }
 0x11f   : > { %v794_v60 = vsel %vm793_vm6, %v1955_v54, %v1956_v53  ;;  %v1875_v54 = vld [vmem:[%s2369_s4 + $0x18] sm:$0xf] }
 0x120   : > { %875 = vmatpush.msrb.mxu2 %v853_v57  ;;  %816 = vmatpush.msra.mxu0 %v794_v60 }
 0x121   : > { %1846 = vmatmul.msk.f32.vlgmr.msra.gmra.mxu2 %vm566_vm2, %v614_v58  ;;  %1847 = vmatmul.msk.f32.vlgmr.msra.gmra.mxu3 %vm566_vm2, %v614_v58 }
 0x122   : > { %1849 = vmatmul.msk.f32.vlgmr.msra.gmra.mxu0 %vm566_vm2, %v1848_v61  ;;  %v792_v62 = vpop.permute.xlu1 %791  ;;  %v1974_v3 = vpop.permute.xlu2 %1973 }
 0x123   : > { %v795_v63 = vsel %vm793_vm6, %v1956_v53, %v792_v62  ;;  %v1976_v7 = vunpack.i.h.bf16 %v1974_v3  ;;  %v1975_v8 = vunpack.i.l.bf16 %v1974_v3  ;;  %v1884_v3 = vld [vmem:[%s2368_s3 + $0x20] sm:$0xf] }
 0x124   : > { %v852_v0 = vpop.permute.xlu0 %851  ;;  %836 = vmatpush.msra.mxu1 %v795_v63 }
 0x125   : > { %v854_v1 = vsel %vm500_vm0, %v1961_v47, %v852_v0  ;;  %1850 = vmatmul.msk.f32.vlgmr.msra.gmra.mxu1 %vm566_vm2, %v1848_v61  ;;  %v1129_v20 = vsel %vm1128_vm9, %v1975_v8, %v1976_v7  ;;  %v1878_v61 = vld [vmem:[%s2368_s3 + $0x1c] sm:$0xf]  ;;  %v1887_v8 = vld [vmem:[%s2369_s4 + $0x20] sm:$0xf] }
 0x126   : > { %895 = vmatpush.msrb.mxu3 %v854_v1  ;;  %v1881_v1 = vld [vmem:[%s2369_s4 + $0x1c] sm:$0xf] }
 0x129   : > { %1852 = vmatmul.msk.f32.vlgmr.msrb.gmra.mxu2 %vm566_vm2, %v1851_v2  ;;  %1853 = vmatmul.msk.f32.vlgmr.msrb.gmra.mxu3 %vm566_vm2, %v1851_v2 }
 0x12a   : > { %v1964_v4 = vpop.permute.xlu1 %1963  ;;  %v2207_v23 = vpop.permute.xlu2 %1362 }
 0x12b   : > { %v1966_v5 = vunpack.i.h.bf16 %v1964_v4  ;;  %v1965_v6 = vunpack.i.l.bf16 %v1964_v4 }
 0x12c   : > { %v1969_v9 = vpop.permute.xlu0 %1968 }
 0x12d   : > { %v1971_v11 = vunpack.i.h.bf16 %v1969_v9  ;;  %v1970_v12 = vunpack.i.l.bf16 %v1969_v9  ;;  %v911_v13 = vsel %vm910_vm7, %v1965_v6, %v1966_v5  ;;  %v912_v14 = vsel %vm910_vm7, %v1966_v5, %v909_v42 }
 0x12e   : > { %933 = vmatpush.msrb.mxu0 %v911_v13  ;;  %953 = vmatpush.msrb.mxu1 %v912_v14 }
 0x12f   : > { %1855 = vmatmul.msk.f32.vlgmr.msrb.gmra.mxu0 %vm566_vm2, %v1854_v10  ;;  %1856 = vmatmul.msk.f32.vlgmr.msrb.gmra.mxu1 %vm566_vm2, %v1854_v10  ;;  %v971_v15 = vsel %vm970_vm8, %v1970_v12, %v1971_v11 }
 0x130   : > { %1040 = vmatpush.msra.mxu0 %v2116_v16  ;;  %1060 = vmatpush.msra.mxu1 %v2118_v17 }
 0x131   : > { %993 = vmatpush.msra.mxu2 %v971_v15 }
 0x132   : > { %1151 = vmatpush.msrb.mxu0 %v1129_v20  ;;  %1858 = vmatmul.msk.f32.vlgmr.msra.gmra.mxu2 %vm566_vm2, %v1857_v19  ;;  %v969_v21 = vpop.permute.xlu1 %968 }
 0x133   : > { %1087 = vmatpush.msrb.mxu2 %v2116_v16  ;;  %v972_v22 = vsel %vm970_vm8, %v1971_v11, %v969_v21  ;;  %v1863_v16 = vld [vmem:[%s2369_s4 + $0x10] sm:$0xf] }
 0x134   : > { %v1127_v24 = vpop.permute.xlu0 %1126  ;;  %1013 = vmatpush.msra.mxu3 %v972_v22 }
 0x135   : > { %v1130_v26 = vsel %vm1128_vm9, %v1976_v7, %v1127_v24  ;;  %1859 = vmatmul.msk.f32.vlgmr.msra.gmra.mxu3 %vm566_vm2, %v1857_v19 }
 0x136   : > { %1107 = vmatpush.msrb.mxu3 %v2118_v17  ;;  %1171 = vmatpush.msrb.mxu1 %v1130_v26  ;;  %v1989_v17 = vpop.permute.xlu2 %1988 }
 0x137   : > { %1861 = vmatmul.msk.f32.vlgmr.msra.gmra.mxu0 %vm566_vm2, %v1860_v25  ;;  %1862 = vmatmul.msk.f32.vlgmr.msra.gmra.mxu1 %vm566_vm2, %v1860_v25  ;;  %v1991_v30 = vunpack.i.h.bf16 %v1989_v17  ;;  %v1990_v31 = vunpack.i.l.bf16 %v1989_v17 }
 0x139   : > { %v1307_v42 = vsel %vm1306_vm11, %v1990_v31, %v1991_v30 }
 0x13a   : > { %1864 = vmatmul.msk.f32.vlgmr.msrb.gmra.mxu2 %vm566_vm2, %v1863_v16  ;;  %v1245_v27 = vpop.permute.xlu1 %1244 }
 0x13c   : > { %v1305_v28 = vpop.permute.xlu0 %1304 }
 0x13d   : > { %1865 = vmatmul.msk.f32.vlgmr.msrb.gmra.mxu3 %vm566_vm2, %v1863_v16  ;;  %v1308_v43 = vsel %vm1306_vm11, %v1991_v30, %v1305_v28  ;;  %v362_v16 = vlaneseq }
 0x13e   : > { %v2004_v47 = vpop.permute.xlu2 %2003 }
 0x13f   : > { %1867 = vmatmul.msk.f32.vlgmr.msrb.gmra.mxu0 %vm566_vm2, %v1866_v29  ;;  %1868 = vmatmul.msk.f32.vlgmr.msrb.gmra.mxu1 %vm566_vm2, %v1866_v29  ;;  %v2006_v49 = vunpack.i.h.bf16 %v2004_v47  ;;  %v2005_v50 = vunpack.i.l.bf16 %v2004_v47  ;;  %v363_v28 = vand.u32 127, %v362_v16 }
 0x141   : > { %v364_v30 = vadd.s32 128, %v363_v28 }
 0x142   : > { %v1979_v32 = vpop.permute.xlu1 %1978 }
 0x143   : > { %v1981_v33 = vunpack.i.h.bf16 %v1979_v32  ;;  %v1980_v34 = vunpack.i.l.bf16 %v1979_v32 }
 0x144   : > { %v1984_v35 = vpop.permute.xlu0 %1983 }
 0x145   : > { %v1986_v38 = vunpack.i.h.bf16 %v1984_v35  ;;  %v1985_v39 = vunpack.i.l.bf16 %v1984_v35  ;;  %v1189_v40 = vsel %vm1188_vm10, %v1980_v34, %v1981_v33  ;;  %v1190_v41 = vsel %vm1188_vm10, %v1981_v33, %v2175_v59 }
 0x146   : > { %1211 = vmatpush.msra.mxu2 %v1189_v40  ;;  %1231 = vmatpush.msra.mxu3 %v1190_v41  ;;  %v1483_v59 = vsel %vm1482_vm14, %v2005_v50, %v2006_v49  ;;  %v1541_v5 = vpop.permute.xlu2 %1540  ;;  %v369_v33 = vand.u32 15, %v363_v28  ;;  %v376_v34 = vand.u32 15, %v364_v30 }
 0x147   : > { %1870 = vmatmul.msk.f32.vlgmr.msra.gmra.mxu2 %vm566_vm2, %v1869_v36  ;;  %1871 = vmatmul.msk.f32.vlgmr.msra.gmra.mxu3 %vm566_vm2, %v1869_v36  ;;  %v1247_v44 = vsel %vm1246_vm12, %v1985_v39, %v1986_v38  ;;  %v1248_v45 = vsel %vm1246_vm12, %v1986_v38, %v1245_v27 }
 0x148   : > { %1329 = vmatpush.msrb.mxu2 %v1307_v42  ;;  %1349 = vmatpush.msrb.mxu3 %v1308_v43  ;;  %v401_v35 = vadd.s32 4294967293, %v369_v33  ;;  %v389_v36 = vadd.s32 4294967292, %v369_v33  ;;  %v402_v37 = vadd.s32 4294967293, %v376_v34  ;;  %v390_v38 = vadd.s32 4294967292, %v376_v34 }
 0x149   : > { %1269 = vmatpush.msra.mxu0 %v1247_v44  ;;  %1289 = vmatpush.msra.mxu1 %v1248_v45  ;;  %v413_v39 = vadd.s32 4294967294, %v369_v33  ;;  %v414_v42 = vadd.s32 4294967294, %v376_v34  ;;  %v425_v43 = vadd.s32 4294967295, %v369_v33  ;;  %v426_v44 = vadd.s32 4294967295, %v376_v34 }
 0x14a   : > { %1873 = vmatmul.msk.f32.vlgmr.msra.gmra.mxu0 %vm566_vm2, %v1872_v46  ;;  %1874 = vmatmul.msk.f32.vlgmr.msra.gmra.mxu1 %vm566_vm2, %v1872_v46  ;;  %v1994_v48 = vpop.permute.xlu1 %1993  ;;  %vm403_vm0 = vcmp.ge.s32.totalorder %v401_v35, 0  ;;  %vm391_vm1 = vcmp.ge.s32.totalorder %v389_v36, 0  ;;  %vm392_vm4 = vcmp.ge.s32.totalorder %v390_v38, 0 }
 0x14b   : > { %v1996_v51 = vunpack.i.h.bf16 %v1994_v48  ;;  %v1995_v52 = vunpack.i.l.bf16 %v1994_v48  ;;  %v1822_v45 = vsel %vm403_vm0, 1.0, %v2025_v18  ;;  %v1820_v48 = vsel %vm391_vm1, 1.0, %v2025_v18 }
 0x14c   : > { %v1999_v53 = vpop.permute.xlu0 %1998  ;;  %vm416_vm6 = vcmp.ge.s32.totalorder %v414_v42, 0  ;;  %vm427_vm7 = vcmp.ge.s32.totalorder %v425_v43, 0  ;;  %vm428_vm8 = vcmp.ge.s32.totalorder %v426_v44, 0  ;;  %vm1621_vm1 = vcmask 1043456  }
 0x14d   : > { %v2001_v55 = vunpack.i.h.bf16 %v1999_v53  ;;  %v2000_v56 = vunpack.i.l.bf16 %v1999_v53  ;;  %v1365_v57 = vsel %vm1364_vm13, %v1995_v52, %v1996_v51  ;;  %v1366_v58 = vsel %vm1364_vm13, %v1996_v51, %v2207_v23 }
 0x14e   : > { %1387 = vmatpush.msrb.mxu0 %v1365_v57  ;;  %1407 = vmatpush.msrb.mxu1 %v1366_v58  ;;  %v437_v51 = vadd.s32 1, %v369_v33  ;;  %v1821_v52 = vsel %vm392_vm4, 1.0, %v2025_v18  ;;  %v1826_v57 = vsel %vm427_vm7, 1.0, %v2025_v18 }
 0x14f   : > { %1876 = vmatmul.msk.f32.vlgmr.msrb.gmra.mxu2 %vm566_vm2, %v1875_v54  ;;  %1877 = vmatmul.msk.f32.vlgmr.msrb.gmra.mxu3 %vm566_vm2, %v1875_v54  ;;  %v1425_v60 = vsel %vm1424_vm15, %v2000_v56, %v2001_v55  ;;  %v438_v54 = vadd.s32 1, %v376_v34  ;;  %v1825_v56 = vsel %vm416_vm6, 1.0, %v2025_v18 }
 0x150   : > { %1505 = vmatpush.msra.mxu0 %v1483_v59  ;;  %1447 = vmatpush.msra.mxu2 %v1425_v60  ;;  %vm441_vm9 = vcmp.lt.s32.totalorder %v437_v51, 16 }
 0x151   : > { %vm442_vm10 = vcmp.lt.s32.totalorder %v438_v54, 16 }
 0x152   : > { %1879 = vmatmul.msk.f32.vlgmr.msrb.gmra.mxu0 %vm566_vm2, %v1878_v61  ;;  %1880 = vmatmul.msk.f32.vlgmr.msrb.gmra.mxu1 %vm566_vm2, %v1878_v61  ;;  %v1423_v62 = vpop.permute.xlu1 %1422  ;;  %v1827_v61 = vsel %vm428_vm8, 1.0, %v2025_v18 }
 0x153   : > { %v1426_v63 = vsel %vm1424_vm15, %v2001_v55, %v1423_v62  ;;  %v449_v62 = vadd.s32 2, %v369_v33 }
 0x154   : > { %v1481_v0 = vpop.permute.xlu0 %1480  ;;  %1467 = vmatpush.msra.mxu3 %v1426_v63  ;;  %v450_v63 = vadd.s32 2, %v376_v34 }
 0x155   : > { %v1484_v2 = vsel %vm1482_vm14, %v2006_v49, %v1481_v0  ;;  %vm453_vm11 = vcmp.lt.s32.totalorder %v449_v62, 16 }
 0x156   : > { %1525 = vmatpush.msra.mxu1 %v1484_v2  ;;  %vm454_vm12 = vcmp.lt.s32.totalorder %v450_v63, 16  ;;  %v1830_v28 = vsel %vm453_vm11, 1.0, %v2025_v18 }
 0x157   : > { %1882 = vmatmul.msk.f32.vlgmr.msra.gmra.mxu2 %vm566_vm2, %v1881_v1  ;;  %1883 = vmatmul.msk.f32.vlgmr.msra.gmra.mxu3 %vm566_vm2, %v1881_v1  ;;  %v1831_v30 = vsel %vm454_vm12, 1.0, %v2025_v18 }
 0x15a   : > { %1885 = vmatmul.msk.f32.vlgmr.msra.gmra.mxu0 %vm566_vm2, %v1884_v3  ;;  %1886 = vmatmul.msk.f32.vlgmr.msra.gmra.mxu1 %vm566_vm2, %v1884_v3  ;;  %v2009_v4 = vpop.permute.xlu1 %2008 }
 0x15b   : > { %v2011_v6 = vunpack.i.h.bf16 %v2009_v4  ;;  %v2010_v7 = vunpack.i.l.bf16 %v2009_v4 }
 0x15d   : > { %v1543_v9 = vsel %vm737_vm5, %v2011_v6, %v1541_v5  ;;  %v1542_v10 = vsel %vm737_vm5, %v2010_v7, %v2011_v6  ;;  %vm415_vm5 = vcmp.ge.s32.totalorder %v413_v39, 0  ;;  %v461_v6 = vadd.s32 3, %v369_v33 }
 0x15e   : > { %1564 = vmatpush.msrb.mxu2 %v1542_v10  ;;  %1584 = vmatpush.msrb.mxu3 %v1543_v9  ;;  %v1824_v53 = vsel %vm415_vm5, 1.0, %v2025_v18  ;;  %v462_v7 = vadd.s32 3, %v376_v34 }
 0x15f   : > { %1888 = vmatmul.msk.f32.vlgmr.msrb.gmra.mxu2 %vm566_vm2, %v1887_v8  ;;  %1889 = vmatmul.msk.f32.vlgmr.msrb.gmra.mxu3 %vm566_vm2, %v1887_v8  ;;  %vm404_vm2 = vcmp.ge.s32.totalorder %v402_v37, 0  ;;  %vm465_vm13 = vcmp.lt.s32.totalorder %v461_v6, 16 }
 0x160   : > { %v1823_v50 = vsel %vm404_vm2, 1.0, %v2025_v18  ;;  %vm466_vm14 = vcmp.lt.s32.totalorder %v462_v7, 16  ;;  %v1832_v39 = vsel %vm465_vm13, 1.0, %v2025_v18 }
 0x17c   : > { %v2273_v13 = vpop.f32.mrf.mxu0 }
 0x194   : > { %v587_v11 = vpop.f32.mrf.mxu2  ;;  %v607_v12 = vpop.f32.mrf.mxu3 }
 0x195   : > { %v2275_v14 = vpop.f32.mrf.mxu1  ;;  %v610_v55 = vmul.f32 %v1820_v48, %v587_v11  ;;  %v611_v0 = vmul.f32 %v1821_v52, %v607_v12  ;;  %v1829_v12 = vsel %vm442_vm10, 1.0, %v2025_v18  ;;  %v1732_v48 = vld [vmem:[%s2374_s9] sm:$0xff] }
 0x196   : > { %1736 = vperm.xlu2 %2013, %v1732_v48  }
 0x19c   : > { %v648_v15 = vpop.f32.mrf.mxu2  ;;  %v668_v19 = vpop.f32.mrf.mxu3 }
 0x19d   : > { %v671_v49 = vmul.f32 %v1822_v45, %v648_v15  ;;  %v672_v60 = vmul.f32 %v1823_v50, %v668_v19  ;;  %v1828_v15 = vsel %vm441_vm9, 1.0, %v2025_v18  ;;  %v473_v19 = vadd.s32 4, %v369_v33 }
 0x19e   : > { %v1833_v33 = vsel %vm466_vm14, 1.0, %v2025_v18 }
 0x19f   : > { %v818_v21 = vpop.f32.mrf.mxu0  ;;  %v673_v1 = vadd.f32 %v671_v49, %v610_v55  ;;  %v674_v9 = vadd.f32 %v672_v60, %v611_v0  ;;  %vm477_vm15 = vcmp.lt.s32.totalorder %v473_v19, 16  ;;  %v1595_v0 = vpop.permute.xlu0 %1594 }
 0x1a0   : > { %v841_v2 = vmul.f32 %v1824_v53, %v818_v21  ;;  %v1834_v51 = vsel %vm477_vm15, 1.0, %v2025_v18 }
 0x1a2   : > { %v838_v22 = vpop.f32.mrf.mxu1  ;;  %v843_v11 = vadd.f32 %v841_v2, %v673_v1 }
 0x1a3   : > { %v842_v3 = vmul.f32 %v1825_v56, %v838_v22  ;;  %v474_v22 = vadd.s32 4, %v376_v34 }
 0x1a4   : > { %v2277_v20 = vpop.f32.mrf.mxu2  ;;  %v2279_v23 = vpop.f32.mrf.mxu3 }
 0x1a5   : > { %v844_v21 = vadd.f32 %v842_v3, %v674_v9  ;;  %vm478_vm0 = vcmp.lt.s32.totalorder %v474_v22, 16  ;;  %v763_v50 = vadd.f32 %v2277_v20, %v2273_v13 }
 0x1a6   : > { %v1835_v52 = vsel %vm478_vm0, 1.0, %v2025_v18 }
 0x1ac   : > { %v935_v24 = vpop.f32.mrf.mxu0  ;;  %v955_v25 = vpop.f32.mrf.mxu1 }
 0x1ad   : > { %v2281_v26 = vpop.f32.mrf.mxu2  ;;  %v2283_v27 = vpop.f32.mrf.mxu3  ;;  %v958_v8 = vmul.f32 %v1826_v57, %v935_v24  ;;  %v959_v10 = vmul.f32 %v1827_v61, %v955_v25 }
 0x1ae   : > { %v900_v55 = vadd.f32 %v2281_v26, %v763_v50 }
 0x1af   : > { %v960_v16 = vadd.f32 %v958_v8, %v843_v11  ;;  %v961_v25 = vadd.f32 %v959_v10, %v844_v21  ;;  %v1605_v10 = vpop.permute.xlu1 %1604 }
 0x1b4   : > { %v2285_v29 = vpop.f32.mrf.mxu0  ;;  %v2287_v17 = vpop.f32.mrf.mxu1 }
 0x1b5   : > { %v2289_v31 = vpop.f32.mrf.mxu2  ;;  %v1065_v38 = vadd.f32 %v2285_v29, %v960_v16  ;;  %v1066_v42 = vadd.f32 %v2287_v17, %v961_v25  ;;  %v783_v17 = vadd.f32 %v2279_v23, %v2275_v14  ;;  %v1613_v16 = vld [vmem:[%s2373_s8] sm:$0xff] }
 0x1b6   : > { %v1018_v13 = vadd.f32 %v2289_v31, %v900_v55 }
 0x1b7   : > { %v901_v56 = vadd.f32 %v2283_v27, %v783_v17 }
 0x1b8   : > { %v2291_v32 = vpop.f32.mrf.mxu3 }
 0x1b9   : > { %v1019_v14 = vadd.f32 %v2291_v32, %v901_v56  ;;  %v1611_v32 = vld [vmem:[%s2372_s7] sm:$0xff] }
 0x1bc   : > { %v1153_v40 = vpop.f32.mrf.mxu0  ;;  %v1173_v41 = vpop.f32.mrf.mxu1 }
 0x1bd   : > { %v2294_v46 = vpop.f32.mrf.mxu2  ;;  %v1176_v36 = vmul.f32 %v1828_v15, %v1153_v40  ;;  %v1177_v37 = vmul.f32 %v1829_v12, %v1173_v41 }
 0x1be   : > { %v1112_v1 = vadd.f32 %v2294_v46, %v1018_v13 }
 0x1bf   : > { %v1178_v40 = vadd.f32 %v1176_v36, %v1065_v38  ;;  %v1179_v41 = vadd.f32 %v1177_v37, %v1066_v42 }
 0x1c0   : > { %v2296_v47 = vpop.f32.mrf.mxu3 }
 0x1c1   : > { %v1113_v26 = vadd.f32 %v2296_v47, %v1019_v14 }
 0x1c7   : > { %v1271_v58 = vpop.f32.mrf.mxu0  ;;  %v1291_v59 = vpop.f32.mrf.mxu1 }
 0x1c8   : > { %v1294_v34 = vmul.f32 %v1830_v28, %v1271_v58  ;;  %v1295_v43 = vmul.f32 %v1831_v30, %v1291_v59  ;;  %v1612_v28 = vld [vmem:[%s2372_s7 + $0x8] sm:$0xff] }
 0x1c9   : > { %v1614_v30 = vld [vmem:[%s2373_s8 + $0x8] sm:$0xff] }
 0x1ca   : > { %v2305_v4 = vpop.f32.mrf.mxu2  ;;  %v2307_v5 = vpop.f32.mrf.mxu3  ;;  %v1296_v53 = vadd.f32 %v1294_v34, %v1178_v40  ;;  %v1297_v54 = vadd.f32 %v1295_v43, %v1179_v41 }
 0x1cb   : > { %v1236_v3 = vadd.f32 %v2305_v4, %v1112_v1  ;;  %v1237_v6 = vadd.f32 %v2307_v5, %v1113_v26 }
 0x1cf   : > { %v1389_v24 = vpop.f32.mrf.mxu0  ;;  %v1409_v35 = vpop.f32.mrf.mxu1 }
 0x1d0   : > { %v1412_v29 = vmul.f32 %v1832_v39, %v1389_v24  ;;  %v1413_v49 = vmul.f32 %v1833_v33, %v1409_v35 }
 0x1d2   : > { %v1331_v44 = vpop.f32.mrf.mxu2  ;;  %v1351_v45 = vpop.f32.mrf.mxu3  ;;  %v1414_v59 = vadd.f32 %v1412_v29, %v1296_v53  ;;  %v1415_v60 = vadd.f32 %v1413_v49, %v1297_v54 }
 0x1d3   : > { %v1354_v8 = vadd.f32 %v1331_v44, %v1236_v3  ;;  %v1355_v9 = vadd.f32 %v1351_v45, %v1237_v6  ;;  %v1742_v49 = vpop.permute.xlu0 %1741 }
 0x1d7   : > { %v1507_v57 = vpop.f32.mrf.mxu0  ;;  %v1527_v58 = vpop.f32.mrf.mxu1 }
 0x1d8   : > { %v1530_v61 = vmul.f32 %v1834_v51, %v1507_v57  ;;  %v1531_v62 = vmul.f32 %v1835_v52, %v1527_v58 }
 0x1da   : > { %v1532_v20 = vadd.f32 %v1530_v61, %v1414_v59  ;;  %v1533_v23 = vadd.f32 %v1531_v62, %v1415_v60  ;;  %v1449_v63 = vpop.f32.mrf.mxu2  ;;  %v1469_v18 = vpop.f32.mrf.mxu3 }
 0x1db   : > { %v1472_v46 = vadd.f32 %v1449_v63, %v1354_v8  ;;  %v1473_v47 = vadd.f32 %v1469_v18, %v1355_v9 }
 0x1dc   : > { %v1597_v27 = vadd.f32 %v1595_v0, %v1532_v20  ;;  %v1598_v2 = vadd.f32 %v1595_v0, %v1533_v23 }
 0x1de   : > { %v1599_v7 = vmax.f32 %v1597_v27, 0.0  ;;  %v1600_v31 = vmax.f32 %v1598_v2, 0.0 }
 0x1e0   : > { %1896 = vmatpush.msk.msra.mxu2 %vm1621_vm1, %v1599_v7  ;;  %1899 = vmatpush.msk.msra.mxu3 %vm1621_vm1, %v1600_v31 }
 0x1e1   : > { %1897 = vmatmul.msk.f32.vlgmr.msra.gmra.mxu2 %vm561_vm3, %v1611_v32  ;;  %1900 = vmatmul.msk.f32.vlgmr.msra.gmra.mxu3 %vm561_vm3, %v1611_v32 }
 0x1e2   : > { %v1566_v4 = vpop.f32.mrf.mxu2  ;;  %v1586_v5 = vpop.f32.mrf.mxu3 }
 0x1e3   : > { %v1589_v11 = vadd.f32 %v1566_v4, %v1472_v46  ;;  %v1590_v15 = vadd.f32 %v1586_v5, %v1473_v47 }
 0x1e5   : > { %v1607_v12 = vadd.f32 %v1605_v10, %v1589_v11  ;;  %v1608_v19 = vadd.f32 %v1605_v10, %v1590_v15 }
 0x1e7   : > { %v1609_v21 = vmax.f32 %v1607_v12, 0.0  ;;  %v1610_v22 = vmax.f32 %v1608_v19, 0.0 }
 0x1e9   : > { %1890 = vmatpush.msk.msrb.mxu0 %vm1621_vm1, %v1609_v21  ;;  %1893 = vmatpush.msk.msrb.mxu1 %vm1621_vm1, %v1610_v22 }
 0x1ea   : > { %1891 = vmatmul.msk.f32.vlgmr.msrb.gmra.mxu0 %vm561_vm3, %v1613_v16  ;;  %1894 = vmatmul.msk.f32.vlgmr.msrb.gmra.mxu1 %vm561_vm3, %v1613_v16 }
 0x1eb   : > { %1898 = vmatmul.msk.f32.gmra.mxu2 %vm561_vm3, %v1612_v28  ;;  %1901 = vmatmul.msk.f32.gmra.mxu3 %vm561_vm3, %v1612_v28 }
 0x1f0   : > { %v1737_v25 = vpop.permute.xlu2 %1736 }
 0x1f2   : > { %1892 = vmatmul.msk.f32.gmra.mxu0 %vm561_vm3, %v1614_v30  ;;  %1895 = vmatmul.msk.f32.gmra.mxu1 %vm561_vm3, %v1614_v30 }
 0x264   : > { %v1703_v24 = vpop.f32.mrf.mxu2  ;;  %v1726_v35 = vpop.f32.mrf.mxu3 }
 0x267   : > { %v1645_v36 = vpop.f32.mrf.mxu0  ;;  %v1668_v37 = vpop.f32.mrf.mxu1 }
 0x268   : > { %v1704_v38 = vadd.f32 %v1703_v24, %v1645_v36  ;;  %v1727_v39 = vadd.f32 %v1726_v35, %v1668_v37 }
 0x26a   : > { %v1744_v33 = vadd.f32 %v1737_v25, %v1704_v38  ;;  %v1745_v42 = vadd.f32 %v1737_v25, %v1727_v39 }
 0x26c   : > { %v1748_v34 = vmax.f32 %v1744_v33, 0.0  ;;  %v1749_v43 = vmax.f32 %v1745_v42, 0.0 }
 0x26e   : > { %v1706_v44 = vpop.f32.mrf.mxu2  ;;  %v1729_v45 = vpop.f32.mrf.mxu3  ;;  %1752 = vst [vmem:[%s359_s21] sm:$0xff] %v1748_v34 }
 0x26f   : > { %v1648_v48 = vpop.f32.mrf.mxu0  ;;  %v1671_v40 = vpop.f32.mrf.mxu1  ;;  %1753 = vst [vmem:[%s359_s21 + $0x8] sm:$0xff] %v1749_v43 }
 0x270   : > { %v1707_v41 = vadd.f32 %v1706_v44, %v1648_v48  ;;  %v1730_v29 = vadd.f32 %v1729_v45, %v1671_v40 }
 0x272   : > { %v1746_v50 = vadd.f32 %v1742_v49, %v1707_v41  ;;  %v1747_v17 = vadd.f32 %v1742_v49, %v1730_v29 }
 0x274   : > { %v1750_v51 = vmax.f32 %v1746_v50, 0.0  ;;  %v1751_v52 = vmax.f32 %v1747_v17, 0.0 }
 0x276   : > { %1754 = vst [vmem:[%s359_s21 + $0x10] sm:$0xff] %v1750_v51 }
 0x277   : > { %1755 = vst [vmem:[%s359_s21 + $0x18] sm:$0xff] %v1751_v52 }
 0x278 PF: > { %s20_s13 = sadd.s32 1, %s2020_s13  }
 0x279   : > { %p17_p4 = scmp.ge.s32.totalorder %s20_s13, 4  }
 0x27b   :  { %19 = sbr.rel (!%p17_p4) target bundleno = 1 (0x1), region = 106 }

</bundles_post_ra>
